<compile_context>
chip_gen: v5e
topology: v5e:2x2
jax: 0.10.0
libtpu: 0.0.40
codegen_flags: <defaults>
</compile_context>

<pallas_src>
import functools

import jax
import jax.numpy as jnp
from jax.experimental import pallas as pl
from jax.experimental.pallas import tpu as pltpu

EPS = 1e-5
_VMEM_LIMIT = 32 * 1024 * 1024   # safe on every generation (v7x physical = 64 MiB)


def _round_up(x, m):
    return ((x + m - 1) // m) * m


def _pick_tm(m, cap=512):
    """Row-block: multiple of 16 (bf16 sublane packing), capped, and >=2 blocks
    along the parallel grid axis when possible so v7x's 2 TCs are both used."""
    tm = min(cap, _round_up(m, 16))
    if m >= 32 and (m + tm - 1) // tm < 2:
        tm = _round_up((m + 1) // 2, 16)
    return tm


# ----------------------------------------------------------------------------
# 3x3 conv as 3 banded MXU matmuls, with fused per-column BN statistics
# ----------------------------------------------------------------------------
def _make_conv3x3_kernel(ho, pregathered):
    def kernel(x_ref, w_ref, o_ref, st_ref):
        acc = None
        for ky in range(3):
            if pregathered:                       # stride != 1: rows pre-selected
                a = x_ref[0, ky]                  # (Ho, Kin)
            else:                                 # stride == 1: shifted window
                a = x_ref[0, pl.ds(ky, ho), :]    # (Ho, Kin)
            p = jnp.dot(a, w_ref[ky], preferred_element_type=jnp.float32)
            acc = p if acc is None else acc + p
        o_ref[0] = acc.astype(o_ref.dtype)
        st_ref[0, 0:1, :] = jnp.sum(acc, axis=0, keepdims=True)
        st_ref[0, 1:2, :] = jnp.sum(acc * acc, axis=0, keepdims=True)
    return kernel


def _band_weight(w, width, wo, stride, kin_pad):
    """Banded weight for conv3x3-as-matmul.

    w: (Cout, Cin, 3, 3) PyTorch layout.  Returns (3, kin_pad, Wo*Cout) bf16
    with wb[ky, x*Cin+ci, wo*Cout+co] = w[co, ci, ky, x - wo*stride] when the
    tap index is in [0, 3), else 0.
    """
    cout, cin = w.shape[0], w.shape[1]
    wpad = width + 2
    wt = jnp.transpose(w, (2, 3, 1, 0)).astype(jnp.float32)        # (3,3,Cin,Cout)
    x_idx = jnp.arange(wpad)
    wo_idx = jnp.arange(wo)
    kx = x_idx[:, None] - wo_idx[None, :] * stride                 # (Wpad, Wo)
    valid = (kx >= 0) & (kx < 3)
    kxc = jnp.clip(kx, 0, 2)
    wb = wt[:, kxc, :, :]                                          # (3,Wpad,Wo,Cin,Cout)
    wb = jnp.where(valid[None, :, :, None, None], wb, 0.0)
    wb = jnp.transpose(wb, (0, 1, 3, 2, 4)).reshape(3, wpad * cin, wo * cout)
    wb = jnp.pad(wb, ((0, 0), (0, kin_pad - wpad * cin), (0, 0)))
    return wb.astype(jnp.bfloat16)


def conv3x3_bn_stats(x_nhwc, w, stride):
    """3x3 conv, padding=1, no bias.  Returns the pre-BN output in lane-dense
    layout (N*Ho, Wo*Cout) bf16, per-channel sum / sum-of-squares (f32), and
    the output spatial dims."""
    n, h, width, cin = x_nhwc.shape
    cout = w.shape[0]
    ho = (h + 2 - 3) // stride + 1
    wo = (width + 2 - 3) // stride + 1
    kin = (width + 2) * cin
    kin_pad = _round_up(kin, 128)        # aligned, unmasked lane loads
    nout = wo * cout

    xp = jnp.pad(x_nhwc.astype(jnp.bfloat16), ((0, 0), (1, 1), (1, 1), (0, 0)))
    xp2 = xp.reshape(n, h + 2, kin)
    if kin_pad != kin:
        xp2 = jnp.pad(xp2, ((0, 0), (0, 0), (0, kin_pad - kin)))

    wb = _band_weight(w, width, wo, stride, kin_pad)               # (3, Kin, Nout)

    if stride == 1:
        x_in = xp2                                                 # (N, H+2, Kin)
        in_block = (1, h + 2, kin_pad)
        in_map = lambda i: (i, 0, 0)
        pregathered = False
    else:
        # Pre-select the rows each ky tap needs (3x padded-input dup, not 9x).
        rows = [xp2[:, ky: ky + stride * (ho - 1) + 1: stride, :] for ky in range(3)]
        x_in = jnp.stack(rows, axis=1)                             # (N, 3, Ho, Kin)
        in_block = (1, 3, ho, kin_pad)
        in_map = lambda i: (i, 0, 0, 0)
        pregathered = True

    out, st = pl.pallas_call(
        _make_conv3x3_kernel(ho, pregathered),
        grid=(n,),
        in_specs=[
            pl.BlockSpec(in_block, in_map),
            pl.BlockSpec((3, kin_pad, nout), lambda i: (0, 0, 0)),
        ],
        out_specs=(
            pl.BlockSpec((1, ho, nout), lambda i: (i, 0, 0)),
            pl.BlockSpec((1, 8, nout), lambda i: (i, 0, 0)),
        ),
        out_shape=(
            jax.ShapeDtypeStruct((n, ho, nout), jnp.bfloat16),
            jax.ShapeDtypeStruct((n, 8, nout), jnp.float32),
        ),
        compiler_params=pltpu.CompilerParams(
            dimension_semantics=("parallel",),
            vmem_limit_bytes=_VMEM_LIMIT,
        ),
    )(x_in, wb)

    col_sum = jnp.sum(st[:, 0, :], axis=0).reshape(wo, cout).sum(0)
    col_sumsq = jnp.sum(st[:, 1, :], axis=0).reshape(wo, cout).sum(0)
    return out.reshape(n * ho, nout), col_sum, col_sumsq, (n, ho, wo, cout)


# ----------------------------------------------------------------------------
# Lane-dense matmul (1 or 2 accumulated A@B pairs) with fused BN statistics
# ----------------------------------------------------------------------------
def _make_mm_kernel(npairs):
    def kernel(*refs):
        a_refs = refs[:npairs]
        b_refs = refs[npairs:2 * npairs]
        o_ref = refs[2 * npairs]
        st_ref = refs[2 * npairs + 1]
        acc = None
        for a_ref, b_ref in zip(a_refs, b_refs):
            p = jnp.dot(a_ref[...], b_ref[...], preferred_element_type=jnp.float32)
            acc = p if acc is None else acc + p
        o_ref[...] = acc.astype(o_ref.dtype)
        st_ref[0, 0:1, :] = jnp.sum(acc, axis=0, keepdims=True)
        st_ref[0, 1:2, :] = jnp.sum(acc * acc, axis=0, keepdims=True)
    return kernel


def matmul_bn_stats(a_list, b_list):
    """sum_i a_i @ b_i  (bf16 operands, f32 accumulation) + per-column stats.
    K and N blocks are full-extent (small channel dims); M is row-tiled."""
    m = a_list[0].shape[0]
    n2 = b_list[0].shape[1]
    npairs = len(a_list)
    tm = _pick_tm(m)
    mp = _round_up(m, tm)
    gm = mp // tm

    args, in_specs = [], []
    for a in a_list:
        k = a.shape[1]
        args.append(jnp.pad(a.astype(jnp.bfloat16), ((0, mp - m), (0, 0))))
        in_specs.append(pl.BlockSpec((tm, k), lambda i: (i, 0)))
    for b in b_list:
        k = b.shape[0]
        args.append(b.astype(jnp.bfloat16))
        in_specs.append(pl.BlockSpec((k, n2), lambda i: (0, 0)))

    out, st = pl.pallas_call(
        _make_mm_kernel(npairs),
        grid=(gm,),
        in_specs=in_specs,
        out_specs=(
            pl.BlockSpec((tm, n2), lambda i: (i, 0)),
            pl.BlockSpec((1, 8, n2), lambda i: (i, 0, 0)),
        ),
        out_shape=(
            jax.ShapeDtypeStruct((mp, n2), jnp.bfloat16),
            jax.ShapeDtypeStruct((gm, 8, n2), jnp.float32),
        ),
        compiler_params=pltpu.CompilerParams(
            dimension_semantics=("parallel",),
            vmem_limit_bytes=_VMEM_LIMIT,
        ),
    )(*args)
    return out[:m], jnp.sum(st[:, 0, :], axis=0), jnp.sum(st[:, 1, :], axis=0)


def conv1x1_bn_stats(x_lane_list, w_list, wo):
    """Sum of 1x1 convs on lane-dense (M, Wo*Cin_i) inputs via block-diagonal
    weights.  Returns pre-BN (M, Wo*Cout) bf16 + per-channel stats."""
    cout = w_list[0].shape[0]
    eye = jnp.eye(wo, dtype=jnp.float32)
    b_list = []
    for w in w_list:
        wt = w.reshape(cout, -1).T.astype(jnp.float32)           # (Cin, Cout)
        b_list.append(jnp.kron(eye, wt))                         # (Wo*Cin, Wo*Cout)
    out, s, ss = matmul_bn_stats(x_lane_list, b_list)
    return out, s.reshape(wo, cout).sum(0), ss.reshape(wo, cout).sum(0)


# ----------------------------------------------------------------------------
# Fused BN-apply: y = x*scale + shift [+ (residual[*rscale + rshift])] [ReLU]
# ----------------------------------------------------------------------------
def _make_affine_kernel(relu, residual_mode):
    # residual_mode: 0 = none, 1 = plain add, 2 = residual has its own BN fold
    def kernel(*refs):
        idx = 0
        x_ref = refs[idx]; idx += 1
        sc_ref = refs[idx]; idx += 1
        sh_ref = refs[idx]; idx += 1
        r_ref = rsc_ref = rsh_ref = None
        if residual_mode:
            r_ref = refs[idx]; idx += 1
            if residual_mode == 2:
                rsc_ref = refs[idx]; idx += 1
                rsh_ref = refs[idx]; idx += 1
        o_ref = refs[idx]
        y = x_ref[...].astype(jnp.float32) * sc_ref[...] + sh_ref[...]
        if residual_mode == 1:
            y = y + r_ref[...].astype(jnp.float32)
        elif residual_mode == 2:
            y = y + r_ref[...].astype(jnp.float32) * rsc_ref[...] + rsh_ref[...]
        if relu:
            y = jnp.maximum(y, 0.0)
        o_ref[...] = y.astype(o_ref.dtype)
    return kernel


def bn_apply(x, scale_l, shift_l, residual=None, res_scale_l=None,
             res_shift_l=None, relu=True, out_dtype=jnp.bfloat16):
    """Lane-dense elementwise epilogue on (M, N2) with N2 = Wo*C >= 128."""
    m, n2 = x.shape
    tm = _pick_tm(m)
    mp = _round_up(m, tm)
    gm = mp // tm

    def pad_rows(t):
        return jnp.pad(t.astype(jnp.bfloat16), ((0, mp - m), (0, 0)))

    args = [pad_rows(x), scale_l.reshape(1, n2).astype(jnp.float32),
            shift_l.reshape(1, n2).astype(jnp.float32)]
    in_specs = [pl.BlockSpec((tm, n2), lambda i: (i, 0)),
                pl.BlockSpec((1, n2), lambda i: (0, 0)),
                pl.BlockSpec((1, n2), lambda i: (0, 0))]
    residual_mode = 0
    if residual is not None:
        residual_mode = 1
        args.append(pad_rows(residual))
        in_specs.append(pl.BlockSpec((tm, n2), lambda i: (i, 0)))
        if res_scale_l is not None:
            residual_mode = 2
            args += [res_scale_l.reshape(1, n2).astype(jnp.float32),
                     res_shift_l.reshape(1, n2).astype(jnp.float32)]
            in_specs += [pl.BlockSpec((1, n2), lambda i: (0, 0)),
                         pl.BlockSpec((1, n2), lambda i: (0, 0))]

    out = pl.pallas_call(
        _make_affine_kernel(relu, residual_mode),
        grid=(gm,),
        in_specs=in_specs,
        out_specs=pl.BlockSpec((tm, n2), lambda i: (i, 0)),
        out_shape=jax.ShapeDtypeStruct((mp, n2), out_dtype),
        compiler_params=pltpu.CompilerParams(
            dimension_semantics=("parallel",),
            vmem_limit_bytes=_VMEM_LIMIT,
        ),
    )(*args)
    return out[:m]


def bn_scale_shift(col_sum, col_sumsq, count, gamma, beta):
    """Fold train-mode BatchNorm (biased batch stats) into scale/shift (f32)."""
    mean = col_sum / count
    var = jnp.maximum(col_sumsq / count - mean * mean, 0.0)
    inv = jax.lax.rsqrt(var + EPS)
    scale = gamma.astype(jnp.float32) * inv
    shift = beta.astype(jnp.float32) - mean * scale
    return scale, shift


# ----------------------------------------------------------------------------
# BasicBlock / Root / Tree forward (functional)
# ----------------------------------------------------------------------------
def basic_block_forward(x_nhwc, p, stride):
    """DLA BasicBlock: relu(bn1(conv1)) -> bn2(conv2) + shortcut -> relu."""
    cin = x_nhwc.shape[-1]
    cout = p["w1"].shape[0]

    y1_pre, s1, ss1, (n, ho, wo, _) = conv3x3_bn_stats(x_nhwc, p["w1"], stride)
    m = n * ho * wo
    sc1, sh1 = bn_scale_shift(s1, ss1, m, p["g1"], p["b1"])
    y1 = bn_apply(y1_pre, jnp.tile(sc1, wo), jnp.tile(sh1, wo), relu=True)

    y2_pre, s2, ss2, _ = conv3x3_bn_stats(y1.reshape(n, ho, wo, cout),
                                          p["w2"], 1)
    sc2, sh2 = bn_scale_shift(s2, ss2, m, p["g2"], p["b2"])

    if "ws" in p:   # projection shortcut (stride != 1 or channel change)
        xs = x_nhwc[:, ::stride, ::stride, :].reshape(n * ho, wo * cin)
        sp_pre, s_s, ss_s = conv1x1_bn_stats([xs], [p["ws"]], wo)
        scs, shs = bn_scale_shift(s_s, ss_s, m, p["gs"], p["bs"])
        out = bn_apply(y2_pre, jnp.tile(sc2, wo), jnp.tile(sh2, wo),
                       residual=sp_pre,
                       res_scale_l=jnp.tile(scs, wo),
                       res_shift_l=jnp.tile(shs, wo), relu=True)
    else:           # identity shortcut (stride == 1, cin == cout)
        shortcut = x_nhwc.reshape(n * ho, wo * cout)
        out = bn_apply(y2_pre, jnp.tile(sc2, wo), jnp.tile(sh2, wo),
                       residual=shortcut, relu=True)
    return out, (n, ho, wo, cout)


def root_forward(x1, x2, p, wo):
    """Root: concat -> 1x1 conv -> BN -> ReLU, without materializing the
    concat (out = x1 @ BD(w[:, :C]) + x2 @ BD(w[:, C:]))."""
    cout = p["w"].shape[0]
    w2d = p["w"].reshape(cout, 2 * cout)
    out_pre, s, ss = conv1x1_bn_stats([x1, x2],
                                      [w2d[:, :cout], w2d[:, cout:]], wo)
    m = x1.shape[0] * wo
    sc, sh = bn_scale_shift(s, ss, m, p["g"], p["b"])
    return bn_apply(out_pre, jnp.tile(sc, wo), jnp.tile(sh, wo), relu=True)


def tree_forward(x_nchw, params, stride):
    # NCHW boundary kept to match the PyTorch module interface.
    x = jnp.transpose(x_nchw, (0, 2, 3, 1))                       # NCHW -> NHWC
    out1, (n, ho, wo, cout) = basic_block_forward(x, params["left"], stride)
    out2, _ = basic_block_forward(out1.reshape(n, ho, wo, cout),
                                  params["right"], 1)
    out = root_forward(out1, out2, params["root"], wo)            # (n*ho, wo*cout)
    out = out.reshape(n, ho, wo, cout).astype(jnp.float32)
    return jnp.transpose(out, (0, 3, 1, 2))                       # NHWC -> NCHW


# ----------------------------------------------------------------------------
# Deterministic parameter init
# ----------------------------------------------------------------------------
def _conv_w(key, cout, cin, k):
    fan_in = cin * k * k
    return jax.random.normal(key, (cout, cin, k, k), jnp.float32) / jnp.sqrt(fan_in)


def init_basic_block(key, cin, cout, stride):
    k1, k2, k3 = jax.random.split(key, 3)
    p = {
        "w1": _conv_w(k1, cout, cin, 3),
        "g1": jnp.ones((cout,), jnp.float32),
        "b1": jnp.zeros((cout,), jnp.float32),
        "w2": _conv_w(k2, cout, cout, 3),
        "g2": jnp.ones((cout,), jnp.float32),
        "b2": jnp.zeros((cout,), jnp.float32),
    }
    if stride != 1 or cin != cout:
        p["ws"] = _conv_w(k3, cout, cin, 1)
        p["gs"] = jnp.ones((cout,), jnp.float32)
        p["bs"] = jnp.zeros((cout,), jnp.float32)
    return p


def init_tree(key, cin, cout, stride):
    kl, kr, kroot = jax.random.split(key, 3)
    return {
        "left": init_basic_block(kl, cin, cout, stride),
        "right": init_basic_block(kr, cout, cout, 1),
        "root": {
            "w": _conv_w(kroot, cout, 2 * cout, 1),
            "g": jnp.ones((cout,), jnp.float32),
            "b": jnp.zeros((cout,), jnp.float32),
        },
    }


if __name__ == "__main__":
    in_channels, out_channels, stride = 4, 8, 1
    key = jax.random.PRNGKey(0)
    kparams, kx = jax.random.split(key)
    params = init_tree(kparams, in_channels, out_channels, stride)
    x = jax.random.normal(kx, (2, in_channels, 16, 16), jnp.float32)

    fwd = jax.jit(functools.partial(tree_forward, stride=stride))
    out = jax.block_until_ready(fwd(x, params))

    assert out.shape == (2, out_channels, 16, 16), out.shape
    assert bool(jnp.all(jnp.isfinite(out)))
    print("KERNEL_OK")
</pallas_src>

<mosaic_0001>
module attributes {stable_mosaic.version = 11 : i64} {
  func.func @kernel(%arg0: i32, %arg1: memref<1x18x128xbf16, #tpu.memory_space<vmem>>, %arg2: memref<3x128x128xbf16, #tpu.memory_space<vmem>>, %arg3: memref<1x16x128xbf16, #tpu.memory_space<vmem>>, %arg4: memref<1x8x128xf32, #tpu.memory_space<vmem>>) attributes {dimension_semantics = [#tpu.dimension_semantics<parallel>], iteration_bounds = array<i64: 2>, scalar_prefetch = 0 : i64, scratch_operands = 0 : i64, tpu.core_type = #tpu.core_type<tc>, window_params = [{transform_indices = @transform_0, window_bounds = array<i64: 1, 18, 128>}, {pipeline_mode = #tpu.pipeline_mode<synchronous>, transform_indices = @transform_1, window_bounds = array<i64: 3, 128, 128>}, {transform_indices = @transform_2, window_bounds = array<i64: 1, 16, 128>}, {transform_indices = @transform_3, window_bounds = array<i64: 1, 8, 128>}]} {
    %c0 = arith.constant 0 : index
    %c0_0 = arith.constant 0 : index
    %c0_1 = arith.constant 0 : index
    %0 = vector.load %arg1[%c0, %c0_0, %c0_1] : memref<1x18x128xbf16, #tpu.memory_space<vmem>>, vector<1x16x128xbf16>
    %1 = vector.shape_cast %0 : vector<1x16x128xbf16> to vector<16x128xbf16>
    %c0_2 = arith.constant 0 : index
    %c0_3 = arith.constant 0 : index
    %c0_4 = arith.constant 0 : index
    %2 = vector.load %arg2[%c0_2, %c0_3, %c0_4] : memref<3x128x128xbf16, #tpu.memory_space<vmem>>, vector<1x128x128xbf16>
    %3 = vector.shape_cast %2 : vector<1x128x128xbf16> to vector<128x128xbf16>
    %cst = arith.constant dense<0.000000e+00> : vector<16x128xf32>
    %4 = tpu.matmul %1, %3, %cst {dimension_numbers = #tpu.dot_dimension_numbers<[1], [0], [0], [1], [0, 0, 1, 1], [], []>} : vector<16x128xbf16>, vector<128x128xbf16>, vector<16x128xf32> -> vector<16x128xf32>
    %c0_5 = arith.constant 0 : index
    %c1 = arith.constant 1 : index
    %c0_6 = arith.constant 0 : index
    %5 = vector.load %arg1[%c0_5, %c1, %c0_6] : memref<1x18x128xbf16, #tpu.memory_space<vmem>>, vector<1x16x128xbf16>
    %6 = vector.shape_cast %5 : vector<1x16x128xbf16> to vector<16x128xbf16>
    %c1_7 = arith.constant 1 : index
    %c0_8 = arith.constant 0 : index
    %c0_9 = arith.constant 0 : index
    %7 = vector.load %arg2[%c1_7, %c0_8, %c0_9] : memref<3x128x128xbf16, #tpu.memory_space<vmem>>, vector<1x128x128xbf16>
    %8 = vector.shape_cast %7 : vector<1x128x128xbf16> to vector<128x128xbf16>
    %cst_10 = arith.constant dense<0.000000e+00> : vector<16x128xf32>
    %9 = tpu.matmul %6, %8, %cst_10 {dimension_numbers = #tpu.dot_dimension_numbers<[1], [0], [0], [1], [0, 0, 1, 1], [], []>} : vector<16x128xbf16>, vector<128x128xbf16>, vector<16x128xf32> -> vector<16x128xf32>
    %10 = arith.addf %4, %9 : vector<16x128xf32>
    %c0_11 = arith.constant 0 : index
    %c2 = arith.constant 2 : index
    %c0_12 = arith.constant 0 : index
    %11 = vector.load %arg1[%c0_11, %c2, %c0_12] : memref<1x18x128xbf16, #tpu.memory_space<vmem>>, vector<1x16x128xbf16>
    %12 = vector.shape_cast %11 : vector<1x16x128xbf16> to vector<16x128xbf16>
    %c2_13 = arith.constant 2 : index
    %c0_14 = arith.constant 0 : index
    %c0_15 = arith.constant 0 : index
    %13 = vector.load %arg2[%c2_13, %c0_14, %c0_15] : memref<3x128x128xbf16, #tpu.memory_space<vmem>>, vector<1x128x128xbf16>
    %14 = vector.shape_cast %13 : vector<1x128x128xbf16> to vector<128x128xbf16>
    %cst_16 = arith.constant dense<0.000000e+00> : vector<16x128xf32>
    %15 = tpu.matmul %12, %14, %cst_16 {dimension_numbers = #tpu.dot_dimension_numbers<[1], [0], [0], [1], [0, 0, 1, 1], [], []>} : vector<16x128xbf16>, vector<128x128xbf16>, vector<16x128xf32> -> vector<16x128xf32>
    %16 = arith.addf %10, %15 : vector<16x128xf32>
    %17 = arith.truncf %16 : vector<16x128xf32> to vector<16x128xbf16>
    %c0_17 = arith.constant 0 : index
    %c0_18 = arith.constant 0 : index
    %c0_19 = arith.constant 0 : index
    %18 = vector.load %arg3[%c0_17, %c0_18, %c0_19] : memref<1x16x128xbf16, #tpu.memory_space<vmem>>, vector<1x16x128xbf16>
    %19 = vector.shape_cast %18 : vector<1x16x128xbf16> to vector<16x128xbf16>
    %20 = vector.shape_cast %17 : vector<16x128xbf16> to vector<1x16x128xbf16>
    tpu.vector_store %arg3[%c0_17, %c0_18, %c0_19], %20 {strides = array<i32>} : memref<1x16x128xbf16, #tpu.memory_space<vmem>>, vector<1x16x128xbf16>,
    %cst_20 = arith.constant dense<0.000000e+00> : vector<128xf32>
    %21 = vector.multi_reduction <add>, %16, %cst_20 [0] : vector<16x128xf32> to vector<128xf32>
    %22 = vector.shape_cast %21 : vector<128xf32> to vector<1x128xf32>
    %c0_21 = arith.constant 0 : index
    %c0_22 = arith.constant 0 : index
    %c0_23 = arith.constant 0 : index
    %23 = vector.load %arg4[%c0_21, %c0_22, %c0_23] : memref<1x8x128xf32, #tpu.memory_space<vmem>>, vector<1x1x128xf32>
    %24 = vector.shape_cast %23 : vector<1x1x128xf32> to vector<1x128xf32>
    %25 = vector.shape_cast %22 : vector<1x128xf32> to vector<1x1x128xf32>
    tpu.vector_store %arg4[%c0_21, %c0_22, %c0_23], %25 {strides = array<i32>} : memref<1x8x128xf32, #tpu.memory_space<vmem>>, vector<1x1x128xf32>,
    %26 = arith.mulf %16, %16 : vector<16x128xf32>
    %cst_24 = arith.constant dense<0.000000e+00> : vector<128xf32>
    %27 = vector.multi_reduction <add>, %26, %cst_24 [0] : vector<16x128xf32> to vector<128xf32>
    %28 = vector.shape_cast %27 : vector<128xf32> to vector<1x128xf32>
    %c0_25 = arith.constant 0 : index
    %c1_26 = arith.constant 1 : index
    %c0_27 = arith.constant 0 : index
    %29 = vector.load %arg4[%c0_25, %c1_26, %c0_27] : memref<1x8x128xf32, #tpu.memory_space<vmem>>, vector<1x1x128xf32>
    %30 = vector.shape_cast %29 : vector<1x1x128xf32> to vector<1x128xf32>
    %31 = vector.shape_cast %28 : vector<1x128xf32> to vector<1x1x128xf32>
    tpu.vector_store %arg4[%c0_25, %c1_26, %c0_27], %31 {strides = array<i32>} : memref<1x8x128xf32, #tpu.memory_space<vmem>>, vector<1x1x128xf32>,
    return
  }
  func.func @transform_0(%arg0: i32) -> (i32, i32, i32) {
    %c0_i32 = arith.constant 0 : i32
    %c0_i32_0 = arith.constant 0 : i32
    %c0_i32_1 = arith.constant 0 : i32
    return %arg0, %c0_i32, %c0_i32_0 : i32, i32, i32
  }
  func.func @transform_1(%arg0: i32) -> (i32, i32, i32) {
    %c0_i32 = arith.constant 0 : i32
    %c0_i32_0 = arith.constant 0 : i32
    %c0_i32_1 = arith.constant 0 : i32
    %c0_i32_2 = arith.constant 0 : i32
    return %c0_i32, %c0_i32_0, %c0_i32_1 : i32, i32, i32
  }
  func.func @transform_2(%arg0: i32) -> (i32, i32, i32) {
    %c0_i32 = arith.constant 0 : i32
    %c0_i32_0 = arith.constant 0 : i32
    %c0_i32_1 = arith.constant 0 : i32
    return %arg0, %c0_i32, %c0_i32_0 : i32, i32, i32
  }
  func.func @transform_3(%arg0: i32) -> (i32, i32, i32) {
    %c0_i32 = arith.constant 0 : i32
    %c0_i32_0 = arith.constant 0 : i32
    %c0_i32_1 = arith.constant 0 : i32
    return %arg0, %c0_i32, %c0_i32_0 : i32, i32, i32
  }
}

module attributes {stable_mosaic.version = 11 : i64} {
  func.func @kernel(%arg0: i32, %arg1: memref<16x128xbf16, #tpu.memory_space<vmem>>, %arg2: memref<1x128xf32, #tpu.memory_space<vmem>>, %arg3: memref<1x128xf32, #tpu.memory_space<vmem>>, %arg4: memref<16x128xbf16, #tpu.memory_space<vmem>>) attributes {dimension_semantics = [#tpu.dimension_semantics<parallel>], iteration_bounds = array<i64: 2>, scalar_prefetch = 0 : i64, scratch_operands = 0 : i64, tpu.core_type = #tpu.core_type<tc>, window_params = [{transform_indices = @transform_0, window_bounds = array<i64: 16, 128>}, {pipeline_mode = #tpu.pipeline_mode<synchronous>, transform_indices = @transform_1, window_bounds = array<i64: 1, 128>}, {pipeline_mode = #tpu.pipeline_mode<synchronous>, transform_indices = @transform_2, window_bounds = array<i64: 1, 128>}, {transform_indices = @transform_3, window_bounds = array<i64: 16, 128>}]} {
    %c0 = arith.constant 0 : index
    %c0_0 = arith.constant 0 : index
    %0 = vector.load %arg1[%c0, %c0_0] : memref<16x128xbf16, #tpu.memory_space<vmem>>, vector<16x128xbf16>
    %1 = arith.extf %0 : vector<16x128xbf16> to vector<16x128xf32>
    %c0_1 = arith.constant 0 : index
    %c0_2 = arith.constant 0 : index
    %2 = vector.load %arg2[%c0_1, %c0_2] : memref<1x128xf32, #tpu.memory_space<vmem>>, vector<1x128xf32>
    %3 = vector.broadcast %2 : vector<1x128xf32> to vector<16x128xf32>
    %4 = arith.mulf %1, %3 : vector<16x128xf32>
    %c0_3 = arith.constant 0 : index
    %c0_4 = arith.constant 0 : index
    %5 = vector.load %arg3[%c0_3, %c0_4] : memref<1x128xf32, #tpu.memory_space<vmem>>, vector<1x128xf32>
    %6 = vector.broadcast %5 : vector<1x128xf32> to vector<16x128xf32>
    %7 = arith.addf %4, %6 : vector<16x128xf32>
    %cst = arith.constant 0.000000e+00 : f32
    %8 = vector.broadcast %cst : f32 to vector<16x128xf32>
    %9 = arith.maximumf %7, %8 : vector<16x128xf32>
    %10 = arith.truncf %9 : vector<16x128xf32> to vector<16x128xbf16>
    %c0_5 = arith.constant 0 : index
    %c0_6 = arith.constant 0 : index
    %11 = vector.load %arg4[%c0_5, %c0_6] : memref<16x128xbf16, #tpu.memory_space<vmem>>, vector<16x128xbf16>
    tpu.vector_store %arg4[%c0_5, %c0_6], %10 {strides = array<i32>} : memref<16x128xbf16, #tpu.memory_space<vmem>>, vector<16x128xbf16>,
    return
  }
  func.func @transform_0(%arg0: i32) -> (i32, i32) {
    %c0_i32 = arith.constant 0 : i32
    %c0_i32_0 = arith.constant 0 : i32
    return %arg0, %c0_i32 : i32, i32
  }
  func.func @transform_1(%arg0: i32) -> (i32, i32) {
    %c0_i32 = arith.constant 0 : i32
    %c0_i32_0 = arith.constant 0 : i32
    %c0_i32_1 = arith.constant 0 : i32
    return %c0_i32, %c0_i32_0 : i32, i32
  }
  func.func @transform_2(%arg0: i32) -> (i32, i32) {
    %c0_i32 = arith.constant 0 : i32
    %c0_i32_0 = arith.constant 0 : i32
    %c0_i32_1 = arith.constant 0 : i32
    return %c0_i32, %c0_i32_0 : i32, i32
  }
  func.func @transform_3(%arg0: i32) -> (i32, i32) {
    %c0_i32 = arith.constant 0 : i32
    %c0_i32_0 = arith.constant 0 : i32
    return %arg0, %c0_i32 : i32, i32
  }
}

module attributes {stable_mosaic.version = 11 : i64} {
  func.func @kernel(%arg0: i32, %arg1: memref<1x18x256xbf16, #tpu.memory_space<vmem>>, %arg2: memref<3x256x128xbf16, #tpu.memory_space<vmem>>, %arg3: memref<1x16x128xbf16, #tpu.memory_space<vmem>>, %arg4: memref<1x8x128xf32, #tpu.memory_space<vmem>>) attributes {dimension_semantics = [#tpu.dimension_semantics<parallel>], iteration_bounds = array<i64: 2>, scalar_prefetch = 0 : i64, scratch_operands = 0 : i64, tpu.core_type = #tpu.core_type<tc>, window_params = [{transform_indices = @transform_0, window_bounds = array<i64: 1, 18, 256>}, {pipeline_mode = #tpu.pipeline_mode<synchronous>, transform_indices = @transform_1, window_bounds = array<i64: 3, 256, 128>}, {transform_indices = @transform_2, window_bounds = array<i64: 1, 16, 128>}, {transform_indices = @transform_3, window_bounds = array<i64: 1, 8, 128>}]} {
    %c0 = arith.constant 0 : index
    %c0_0 = arith.constant 0 : index
    %c0_1 = arith.constant 0 : index
    %0 = vector.load %arg1[%c0, %c0_0, %c0_1] : memref<1x18x256xbf16, #tpu.memory_space<vmem>>, vector<1x16x256xbf16>
    %1 = vector.shape_cast %0 : vector<1x16x256xbf16> to vector<16x256xbf16>
    %c0_2 = arith.constant 0 : index
    %c0_3 = arith.constant 0 : index
    %c0_4 = arith.constant 0 : index
    %2 = vector.load %arg2[%c0_2, %c0_3, %c0_4] : memref<3x256x128xbf16, #tpu.memory_space<vmem>>, vector<1x256x128xbf16>
    %3 = vector.shape_cast %2 : vector<1x256x128xbf16> to vector<256x128xbf16>
    %cst = arith.constant dense<0.000000e+00> : vector<16x128xf32>
    %4 = tpu.matmul %1, %3, %cst {dimension_numbers = #tpu.dot_dimension_numbers<[1], [0], [0], [1], [0, 0, 1, 1], [], []>} : vector<16x256xbf16>, vector<256x128xbf16>, vector<16x128xf32> -> vector<16x128xf32>
    %c0_5 = arith.constant 0 : index
    %c1 = arith.constant 1 : index
    %c0_6 = arith.constant 0 : index
    %5 = vector.load %arg1[%c0_5, %c1, %c0_6] : memref<1x18x256xbf16, #tpu.memory_space<vmem>>, vector<1x16x256xbf16>
    %6 = vector.shape_cast %5 : vector<1x16x256xbf16> to vector<16x256xbf16>
    %c1_7 = arith.constant 1 : index
    %c0_8 = arith.constant 0 : index
    %c0_9 = arith.constant 0 : index
    %7 = vector.load %arg2[%c1_7, %c0_8, %c0_9] : memref<3x256x128xbf16, #tpu.memory_space<vmem>>, vector<1x256x128xbf16>
    %8 = vector.shape_cast %7 : vector<1x256x128xbf16> to vector<256x128xbf16>
    %cst_10 = arith.constant dense<0.000000e+00> : vector<16x128xf32>
    %9 = tpu.matmul %6, %8, %cst_10 {dimension_numbers = #tpu.dot_dimension_numbers<[1], [0], [0], [1], [0, 0, 1, 1], [], []>} : vector<16x256xbf16>, vector<256x128xbf16>, vector<16x128xf32> -> vector<16x128xf32>
    %10 = arith.addf %4, %9 : vector<16x128xf32>
    %c0_11 = arith.constant 0 : index
    %c2 = arith.constant 2 : index
    %c0_12 = arith.constant 0 : index
    %11 = vector.load %arg1[%c0_11, %c2, %c0_12] : memref<1x18x256xbf16, #tpu.memory_space<vmem>>, vector<1x16x256xbf16>
    %12 = vector.shape_cast %11 : vector<1x16x256xbf16> to vector<16x256xbf16>
    %c2_13 = arith.constant 2 : index
    %c0_14 = arith.constant 0 : index
    %c0_15 = arith.constant 0 : index
    %13 = vector.load %arg2[%c2_13, %c0_14, %c0_15] : memref<3x256x128xbf16, #tpu.memory_space<vmem>>, vector<1x256x128xbf16>
    %14 = vector.shape_cast %13 : vector<1x256x128xbf16> to vector<256x128xbf16>
    %cst_16 = arith.constant dense<0.000000e+00> : vector<16x128xf32>
    %15 = tpu.matmul %12, %14, %cst_16 {dimension_numbers = #tpu.dot_dimension_numbers<[1], [0], [0], [1], [0, 0, 1, 1], [], []>} : vector<16x256xbf16>, vector<256x128xbf16>, vector<16x128xf32> -> vector<16x128xf32>
    %16 = arith.addf %10, %15 : vector<16x128xf32>
    %17 = arith.truncf %16 : vector<16x128xf32> to vector<16x128xbf16>
    %c0_17 = arith.constant 0 : index
    %c0_18 = arith.constant 0 : index
    %c0_19 = arith.constant 0 : index
    %18 = vector.load %arg3[%c0_17, %c0_18, %c0_19] : memref<1x16x128xbf16, #tpu.memory_space<vmem>>, vector<1x16x128xbf16>
    %19 = vector.shape_cast %18 : vector<1x16x128xbf16> to vector<16x128xbf16>
    %20 = vector.shape_cast %17 : vector<16x128xbf16> to vector<1x16x128xbf16>
    tpu.vector_store %arg3[%c0_17, %c0_18, %c0_19], %20 {strides = array<i32>} : memref<1x16x128xbf16, #tpu.memory_space<vmem>>, vector<1x16x128xbf16>,
    %cst_20 = arith.constant dense<0.000000e+00> : vector<128xf32>
    %21 = vector.multi_reduction <add>, %16, %cst_20 [0] : vector<16x128xf32> to vector<128xf32>
    %22 = vector.shape_cast %21 : vector<128xf32> to vector<1x128xf32>
    %c0_21 = arith.constant 0 : index
    %c0_22 = arith.constant 0 : index
    %c0_23 = arith.constant 0 : index
    %23 = vector.load %arg4[%c0_21, %c0_22, %c0_23] : memref<1x8x128xf32, #tpu.memory_space<vmem>>, vector<1x1x128xf32>
    %24 = vector.shape_cast %23 : vector<1x1x128xf32> to vector<1x128xf32>
    %25 = vector.shape_cast %22 : vector<1x128xf32> to vector<1x1x128xf32>
    tpu.vector_store %arg4[%c0_21, %c0_22, %c0_23], %25 {strides = array<i32>} : memref<1x8x128xf32, #tpu.memory_space<vmem>>, vector<1x1x128xf32>,
    %26 = arith.mulf %16, %16 : vector<16x128xf32>
    %cst_24 = arith.constant dense<0.000000e+00> : vector<128xf32>
    %27 = vector.multi_reduction <add>, %26, %cst_24 [0] : vector<16x128xf32> to vector<128xf32>
    %28 = vector.shape_cast %27 : vector<128xf32> to vector<1x128xf32>
    %c0_25 = arith.constant 0 : index
    %c1_26 = arith.constant 1 : index
    %c0_27 = arith.constant 0 : index
    %29 = vector.load %arg4[%c0_25, %c1_26, %c0_27] : memref<1x8x128xf32, #tpu.memory_space<vmem>>, vector<1x1x128xf32>
    %30 = vector.shape_cast %29 : vector<1x1x128xf32> to vector<1x128xf32>
    %31 = vector.shape_cast %28 : vector<1x128xf32> to vector<1x1x128xf32>
    tpu.vector_store %arg4[%c0_25, %c1_26, %c0_27], %31 {strides = array<i32>} : memref<1x8x128xf32, #tpu.memory_space<vmem>>, vector<1x1x128xf32>,
    return
  }
  func.func @transform_0(%arg0: i32) -> (i32, i32, i32) {
    %c0_i32 = arith.constant 0 : i32
    %c0_i32_0 = arith.constant 0 : i32
    %c0_i32_1 = arith.constant 0 : i32
    return %arg0, %c0_i32, %c0_i32_0 : i32, i32, i32
  }
  func.func @transform_1(%arg0: i32) -> (i32, i32, i32) {
    %c0_i32 = arith.constant 0 : i32
    %c0_i32_0 = arith.constant 0 : i32
    %c0_i32_1 = arith.constant 0 : i32
    %c0_i32_2 = arith.constant 0 : i32
    return %c0_i32, %c0_i32_0, %c0_i32_1 : i32, i32, i32
  }
  func.func @transform_2(%arg0: i32) -> (i32, i32, i32) {
    %c0_i32 = arith.constant 0 : i32
    %c0_i32_0 = arith.constant 0 : i32
    %c0_i32_1 = arith.constant 0 : i32
    return %arg0, %c0_i32, %c0_i32_0 : i32, i32, i32
  }
  func.func @transform_3(%arg0: i32) -> (i32, i32, i32) {
    %c0_i32 = arith.constant 0 : i32
    %c0_i32_0 = arith.constant 0 : i32
    %c0_i32_1 = arith.constant 0 : i32
    return %arg0, %c0_i32, %c0_i32_0 : i32, i32, i32
  }
}

module attributes {stable_mosaic.version = 11 : i64} {
  func.func @kernel(%arg0: i32, %arg1: memref<16x64xbf16, #tpu.memory_space<vmem>>, %arg2: memref<64x128xbf16, #tpu.memory_space<vmem>>, %arg3: memref<16x128xbf16, #tpu.memory_space<vmem>>, %arg4: memref<1x8x128xf32, #tpu.memory_space<vmem>>) attributes {dimension_semantics = [#tpu.dimension_semantics<parallel>], iteration_bounds = array<i64: 2>, scalar_prefetch = 0 : i64, scratch_operands = 0 : i64, tpu.core_type = #tpu.core_type<tc>, window_params = [{transform_indices = @transform_0, window_bounds = array<i64: 16, 64>}, {pipeline_mode = #tpu.pipeline_mode<synchronous>, transform_indices = @transform_1, window_bounds = array<i64: 64, 128>}, {transform_indices = @transform_2, window_bounds = array<i64: 16, 128>}, {transform_indices = @transform_3, window_bounds = array<i64: 1, 8, 128>}]} {
    %c0 = arith.constant 0 : index
    %c0_0 = arith.constant 0 : index
    %0 = vector.load %arg1[%c0, %c0_0] : memref<16x64xbf16, #tpu.memory_space<vmem>>, vector<16x64xbf16>
    %c0_1 = arith.constant 0 : index
    %c0_2 = arith.constant 0 : index
    %1 = vector.load %arg2[%c0_1, %c0_2] : memref<64x128xbf16, #tpu.memory_space<vmem>>, vector<64x128xbf16>
    %cst = arith.constant dense<0.000000e+00> : vector<16x128xf32>
    %2 = tpu.matmul %0, %1, %cst {dimension_numbers = #tpu.dot_dimension_numbers<[1], [0], [0], [1], [0, 0, 1, 1], [], []>} : vector<16x64xbf16>, vector<64x128xbf16>, vector<16x128xf32> -> vector<16x128xf32>
    %3 = arith.truncf %2 : vector<16x128xf32> to vector<16x128xbf16>
    %c0_3 = arith.constant 0 : index
    %c0_4 = arith.constant 0 : index
    %4 = vector.load %arg3[%c0_3, %c0_4] : memref<16x128xbf16, #tpu.memory_space<vmem>>, vector<16x128xbf16>
    tpu.vector_store %arg3[%c0_3, %c0_4], %3 {strides = array<i32>} : memref<16x128xbf16, #tpu.memory_space<vmem>>, vector<16x128xbf16>,
    %cst_5 = arith.constant dense<0.000000e+00> : vector<128xf32>
    %5 = vector.multi_reduction <add>, %2, %cst_5 [0] : vector<16x128xf32> to vector<128xf32>
    %6 = vector.shape_cast %5 : vector<128xf32> to vector<1x128xf32>
    %c0_6 = arith.constant 0 : index
    %c0_7 = arith.constant 0 : index
    %c0_8 = arith.constant 0 : index
    %7 = vector.load %arg4[%c0_6, %c0_7, %c0_8] : memref<1x8x128xf32, #tpu.memory_space<vmem>>, vector<1x1x128xf32>
    %8 = vector.shape_cast %7 : vector<1x1x128xf32> to vector<1x128xf32>
    %9 = vector.shape_cast %6 : vector<1x128xf32> to vector<1x1x128xf32>
    tpu.vector_store %arg4[%c0_6, %c0_7, %c0_8], %9 {strides = array<i32>} : memref<1x8x128xf32, #tpu.memory_space<vmem>>, vector<1x1x128xf32>,
    %10 = arith.mulf %2, %2 : vector<16x128xf32>
    %cst_9 = arith.constant dense<0.000000e+00> : vector<128xf32>
    %11 = vector.multi_reduction <add>, %10, %cst_9 [0] : vector<16x128xf32> to vector<128xf32>
    %12 = vector.shape_cast %11 : vector<128xf32> to vector<1x128xf32>
    %c0_10 = arith.constant 0 : index
    %c1 = arith.constant 1 : index
    %c0_11 = arith.constant 0 : index
    %13 = vector.load %arg4[%c0_10, %c1, %c0_11] : memref<1x8x128xf32, #tpu.memory_space<vmem>>, vector<1x1x128xf32>
    %14 = vector.shape_cast %13 : vector<1x1x128xf32> to vector<1x128xf32>
    %15 = vector.shape_cast %12 : vector<1x128xf32> to vector<1x1x128xf32>
    tpu.vector_store %arg4[%c0_10, %c1, %c0_11], %15 {strides = array<i32>} : memref<1x8x128xf32, #tpu.memory_space<vmem>>, vector<1x1x128xf32>,
    return
  }
  func.func @transform_0(%arg0: i32) -> (i32, i32) {
    %c0_i32 = arith.constant 0 : i32
    %c0_i32_0 = arith.constant 0 : i32
    return %arg0, %c0_i32 : i32, i32
  }
  func.func @transform_1(%arg0: i32) -> (i32, i32) {
    %c0_i32 = arith.constant 0 : i32
    %c0_i32_0 = arith.constant 0 : i32
    %c0_i32_1 = arith.constant 0 : i32
    return %c0_i32, %c0_i32_0 : i32, i32
  }
  func.func @transform_2(%arg0: i32) -> (i32, i32) {
    %c0_i32 = arith.constant 0 : i32
    %c0_i32_0 = arith.constant 0 : i32
    return %arg0, %c0_i32 : i32, i32
  }
  func.func @transform_3(%arg0: i32) -> (i32, i32, i32) {
    %c0_i32 = arith.constant 0 : i32
    %c0_i32_0 = arith.constant 0 : i32
    %c0_i32_1 = arith.constant 0 : i32
    return %arg0, %c0_i32, %c0_i32_0 : i32, i32, i32
  }
}

module attributes {stable_mosaic.version = 11 : i64} {
  func.func @kernel(%arg0: i32, %arg1: memref<16x128xbf16, #tpu.memory_space<vmem>>, %arg2: memref<1x128xf32, #tpu.memory_space<vmem>>, %arg3: memref<1x128xf32, #tpu.memory_space<vmem>>, %arg4: memref<16x128xbf16, #tpu.memory_space<vmem>>, %arg5: memref<1x128xf32, #tpu.memory_space<vmem>>, %arg6: memref<1x128xf32, #tpu.memory_space<vmem>>, %arg7: memref<16x128xbf16, #tpu.memory_space<vmem>>) attributes {dimension_semantics = [#tpu.dimension_semantics<parallel>], iteration_bounds = array<i64: 2>, scalar_prefetch = 0 : i64, scratch_operands = 0 : i64, tpu.core_type = #tpu.core_type<tc>, window_params = [{transform_indices = @transform_0, window_bounds = array<i64: 16, 128>}, {pipeline_mode = #tpu.pipeline_mode<synchronous>, transform_indices = @transform_1, window_bounds = array<i64: 1, 128>}, {pipeline_mode = #tpu.pipeline_mode<synchronous>, transform_indices = @transform_2, window_bounds = array<i64: 1, 128>}, {transform_indices = @transform_3, window_bounds = array<i64: 16, 128>}, {pipeline_mode = #tpu.pipeline_mode<synchronous>, transform_indices = @transform_4, window_bounds = array<i64: 1, 128>}, {pipeline_mode = #tpu.pipeline_mode<synchronous>, transform_indices = @transform_5, window_bounds = array<i64: 1, 128>}, {transform_indices = @transform_6, window_bounds = array<i64: 16, 128>}]} {
    %c0 = arith.constant 0 : index
    %c0_0 = arith.constant 0 : index
    %0 = vector.load %arg1[%c0, %c0_0] : memref<16x128xbf16, #tpu.memory_space<vmem>>, vector<16x128xbf16>
    %1 = arith.extf %0 : vector<16x128xbf16> to vector<16x128xf32>
    %c0_1 = arith.constant 0 : index
    %c0_2 = arith.constant 0 : index
    %2 = vector.load %arg2[%c0_1, %c0_2] : memref<1x128xf32, #tpu.memory_space<vmem>>, vector<1x128xf32>
    %3 = vector.broadcast %2 : vector<1x128xf32> to vector<16x128xf32>
    %4 = arith.mulf %1, %3 : vector<16x128xf32>
    %c0_3 = arith.constant 0 : index
    %c0_4 = arith.constant 0 : index
    %5 = vector.load %arg3[%c0_3, %c0_4] : memref<1x128xf32, #tpu.memory_space<vmem>>, vector<1x128xf32>
    %6 = vector.broadcast %5 : vector<1x128xf32> to vector<16x128xf32>
    %7 = arith.addf %4, %6 : vector<16x128xf32>
    %c0_5 = arith.constant 0 : index
    %c0_6 = arith.constant 0 : index
    %8 = vector.load %arg4[%c0_5, %c0_6] : memref<16x128xbf16, #tpu.memory_space<vmem>>, vector<16x128xbf16>
    %9 = arith.extf %8 : vector<16x128xbf16> to vector<16x128xf32>
    %c0_7 = arith.constant 0 : index
    %c0_8 = arith.constant 0 : index
    %10 = vector.load %arg5[%c0_7, %c0_8] : memref<1x128xf32, #tpu.memory_space<vmem>>, vector<1x128xf32>
    %11 = vector.broadcast %10 : vector<1x128xf32> to vector<16x128xf32>
    %12 = arith.mulf %9, %11 : vector<16x128xf32>
    %13 = arith.addf %7, %12 : vector<16x128xf32>
    %c0_9 = arith.constant 0 : index
    %c0_10 = arith.constant 0 : index
    %14 = vector.load %arg6[%c0_9, %c0_10] : memref<1x128xf32, #tpu.memory_space<vmem>>, vector<1x128xf32>
    %15 = vector.broadcast %14 : vector<1x128xf32> to vector<16x128xf32>
    %16 = arith.addf %13, %15 : vector<16x128xf32>
    %cst = arith.constant 0.000000e+00 : f32
    %17 = vector.broadcast %cst : f32 to vector<16x128xf32>
    %18 = arith.maximumf %16, %17 : vector<16x128xf32>
    %19 = arith.truncf %18 : vector<16x128xf32> to vector<16x128xbf16>
    %c0_11 = arith.constant 0 : index
    %c0_12 = arith.constant 0 : index
    %20 = vector.load %arg7[%c0_11, %c0_12] : memref<16x128xbf16, #tpu.memory_space<vmem>>, vector<16x128xbf16>
    tpu.vector_store %arg7[%c0_11, %c0_12], %19 {strides = array<i32>} : memref<16x128xbf16, #tpu.memory_space<vmem>>, vector<16x128xbf16>,
    return
  }
  func.func @transform_0(%arg0: i32) -> (i32, i32) {
    %c0_i32 = arith.constant 0 : i32
    %c0_i32_0 = arith.constant 0 : i32
    return %arg0, %c0_i32 : i32, i32
  }
  func.func @transform_1(%arg0: i32) -> (i32, i32) {
    %c0_i32 = arith.constant 0 : i32
    %c0_i32_0 = arith.constant 0 : i32
    %c0_i32_1 = arith.constant 0 : i32
    return %c0_i32, %c0_i32_0 : i32, i32
  }
  func.func @transform_2(%arg0: i32) -> (i32, i32) {
    %c0_i32 = arith.constant 0 : i32
    %c0_i32_0 = arith.constant 0 : i32
    %c0_i32_1 = arith.constant 0 : i32
    return %c0_i32, %c0_i32_0 : i32, i32
  }
  func.func @transform_3(%arg0: i32) -> (i32, i32) {
    %c0_i32 = arith.constant 0 : i32
    %c0_i32_0 = arith.constant 0 : i32
    return %arg0, %c0_i32 : i32, i32
  }
  func.func @transform_4(%arg0: i32) -> (i32, i32) {
    %c0_i32 = arith.constant 0 : i32
    %c0_i32_0 = arith.constant 0 : i32
    %c0_i32_1 = arith.constant 0 : i32
    return %c0_i32, %c0_i32_0 : i32, i32
  }
  func.func @transform_5(%arg0: i32) -> (i32, i32) {
    %c0_i32 = arith.constant 0 : i32
    %c0_i32_0 = arith.constant 0 : i32
    %c0_i32_1 = arith.constant 0 : i32
    return %c0_i32, %c0_i32_0 : i32, i32
  }
  func.func @transform_6(%arg0: i32) -> (i32, i32) {
    %c0_i32 = arith.constant 0 : i32
    %c0_i32_0 = arith.constant 0 : i32
    return %arg0, %c0_i32 : i32, i32
  }
}

module attributes {stable_mosaic.version = 11 : i64} {
  func.func @kernel(%arg0: i32, %arg1: memref<16x128xbf16, #tpu.memory_space<vmem>>, %arg2: memref<1x128xf32, #tpu.memory_space<vmem>>, %arg3: memref<1x128xf32, #tpu.memory_space<vmem>>, %arg4: memref<16x128xbf16, #tpu.memory_space<vmem>>, %arg5: memref<16x128xbf16, #tpu.memory_space<vmem>>) attributes {dimension_semantics = [#tpu.dimension_semantics<parallel>], iteration_bounds = array<i64: 2>, scalar_prefetch = 0 : i64, scratch_operands = 0 : i64, tpu.core_type = #tpu.core_type<tc>, window_params = [{transform_indices = @transform_0, window_bounds = array<i64: 16, 128>}, {pipeline_mode = #tpu.pipeline_mode<synchronous>, transform_indices = @transform_1, window_bounds = array<i64: 1, 128>}, {pipeline_mode = #tpu.pipeline_mode<synchronous>, transform_indices = @transform_2, window_bounds = array<i64: 1, 128>}, {transform_indices = @transform_3, window_bounds = array<i64: 16, 128>}, {transform_indices = @transform_4, window_bounds = array<i64: 16, 128>}]} {
    %c0 = arith.constant 0 : index
    %c0_0 = arith.constant 0 : index
    %0 = vector.load %arg1[%c0, %c0_0] : memref<16x128xbf16, #tpu.memory_space<vmem>>, vector<16x128xbf16>
    %1 = arith.extf %0 : vector<16x128xbf16> to vector<16x128xf32>
    %c0_1 = arith.constant 0 : index
    %c0_2 = arith.constant 0 : index
    %2 = vector.load %arg2[%c0_1, %c0_2] : memref<1x128xf32, #tpu.memory_space<vmem>>, vector<1x128xf32>
    %3 = vector.broadcast %2 : vector<1x128xf32> to vector<16x128xf32>
    %4 = arith.mulf %1, %3 : vector<16x128xf32>
    %c0_3 = arith.constant 0 : index
    %c0_4 = arith.constant 0 : index
    %5 = vector.load %arg3[%c0_3, %c0_4] : memref<1x128xf32, #tpu.memory_space<vmem>>, vector<1x128xf32>
    %6 = vector.broadcast %5 : vector<1x128xf32> to vector<16x128xf32>
    %7 = arith.addf %4, %6 : vector<16x128xf32>
    %c0_5 = arith.constant 0 : index
    %c0_6 = arith.constant 0 : index
    %8 = vector.load %arg4[%c0_5, %c0_6] : memref<16x128xbf16, #tpu.memory_space<vmem>>, vector<16x128xbf16>
    %9 = arith.extf %8 : vector<16x128xbf16> to vector<16x128xf32>
    %10 = arith.addf %7, %9 : vector<16x128xf32>
    %cst = arith.constant 0.000000e+00 : f32
    %11 = vector.broadcast %cst : f32 to vector<16x128xf32>
    %12 = arith.maximumf %10, %11 : vector<16x128xf32>
    %13 = arith.truncf %12 : vector<16x128xf32> to vector<16x128xbf16>
    %c0_7 = arith.constant 0 : index
    %c0_8 = arith.constant 0 : index
    %14 = vector.load %arg5[%c0_7, %c0_8] : memref<16x128xbf16, #tpu.memory_space<vmem>>, vector<16x128xbf16>
    tpu.vector_store %arg5[%c0_7, %c0_8], %13 {strides = array<i32>} : memref<16x128xbf16, #tpu.memory_space<vmem>>, vector<16x128xbf16>,
    return
  }
  func.func @transform_0(%arg0: i32) -> (i32, i32) {
    %c0_i32 = arith.constant 0 : i32
    %c0_i32_0 = arith.constant 0 : i32
    return %arg0, %c0_i32 : i32, i32
  }
  func.func @transform_1(%arg0: i32) -> (i32, i32) {
    %c0_i32 = arith.constant 0 : i32
    %c0_i32_0 = arith.constant 0 : i32
    %c0_i32_1 = arith.constant 0 : i32
    return %c0_i32, %c0_i32_0 : i32, i32
  }
  func.func @transform_2(%arg0: i32) -> (i32, i32) {
    %c0_i32 = arith.constant 0 : i32
    %c0_i32_0 = arith.constant 0 : i32
    %c0_i32_1 = arith.constant 0 : i32
    return %c0_i32, %c0_i32_0 : i32, i32
  }
  func.func @transform_3(%arg0: i32) -> (i32, i32) {
    %c0_i32 = arith.constant 0 : i32
    %c0_i32_0 = arith.constant 0 : i32
    return %arg0, %c0_i32 : i32, i32
  }
  func.func @transform_4(%arg0: i32) -> (i32, i32) {
    %c0_i32 = arith.constant 0 : i32
    %c0_i32_0 = arith.constant 0 : i32
    return %arg0, %c0_i32 : i32, i32
  }
}

module attributes {stable_mosaic.version = 11 : i64} {
  func.func @kernel(%arg0: i32, %arg1: memref<16x128xbf16, #tpu.memory_space<vmem>>, %arg2: memref<16x128xbf16, #tpu.memory_space<vmem>>, %arg3: memref<128x128xbf16, #tpu.memory_space<vmem>>, %arg4: memref<128x128xbf16, #tpu.memory_space<vmem>>, %arg5: memref<16x128xbf16, #tpu.memory_space<vmem>>, %arg6: memref<1x8x128xf32, #tpu.memory_space<vmem>>) attributes {dimension_semantics = [#tpu.dimension_semantics<parallel>], iteration_bounds = array<i64: 2>, scalar_prefetch = 0 : i64, scratch_operands = 0 : i64, tpu.core_type = #tpu.core_type<tc>, window_params = [{transform_indices = @transform_0, window_bounds = array<i64: 16, 128>}, {transform_indices = @transform_1, window_bounds = array<i64: 16, 128>}, {pipeline_mode = #tpu.pipeline_mode<synchronous>, transform_indices = @transform_2, window_bounds = array<i64: 128, 128>}, {pipeline_mode = #tpu.pipeline_mode<synchronous>, transform_indices = @transform_3, window_bounds = array<i64: 128, 128>}, {transform_indices = @transform_4, window_bounds = array<i64: 16, 128>}, {transform_indices = @transform_5, window_bounds = array<i64: 1, 8, 128>}]} {
    %c0 = arith.constant 0 : index
    %c0_0 = arith.constant 0 : index
    %0 = vector.load %arg1[%c0, %c0_0] : memref<16x128xbf16, #tpu.memory_space<vmem>>, vector<16x128xbf16>
    %c0_1 = arith.constant 0 : index
    %c0_2 = arith.constant 0 : index
    %1 = vector.load %arg3[%c0_1, %c0_2] : memref<128x128xbf16, #tpu.memory_space<vmem>>, vector<128x128xbf16>
    %cst = arith.constant dense<0.000000e+00> : vector<16x128xf32>
    %2 = tpu.matmul %0, %1, %cst {dimension_numbers = #tpu.dot_dimension_numbers<[1], [0], [0], [1], [0, 0, 1, 1], [], []>} : vector<16x128xbf16>, vector<128x128xbf16>, vector<16x128xf32> -> vector<16x128xf32>
    %c0_3 = arith.constant 0 : index
    %c0_4 = arith.constant 0 : index
    %3 = vector.load %arg2[%c0_3, %c0_4] : memref<16x128xbf16, #tpu.memory_space<vmem>>, vector<16x128xbf16>
    %c0_5 = arith.constant 0 : index
    %c0_6 = arith.constant 0 : index
    %4 = vector.load %arg4[%c0_5, %c0_6] : memref<128x128xbf16, #tpu.memory_space<vmem>>, vector<128x128xbf16>
    %cst_7 = arith.constant dense<0.000000e+00> : vector<16x128xf32>
    %5 = tpu.matmul %3, %4, %cst_7 {dimension_numbers = #tpu.dot_dimension_numbers<[1], [0], [0], [1], [0, 0, 1, 1], [], []>} : vector<16x128xbf16>, vector<128x128xbf16>, vector<16x128xf32> -> vector<16x128xf32>
    %6 = arith.addf %2, %5 : vector<16x128xf32>
    %7 = arith.truncf %6 : vector<16x128xf32> to vector<16x128xbf16>
    %c0_8 = arith.constant 0 : index
    %c0_9 = arith.constant 0 : index
    %8 = vector.load %arg5[%c0_8, %c0_9] : memref<16x128xbf16, #tpu.memory_space<vmem>>, vector<16x128xbf16>
    tpu.vector_store %arg5[%c0_8, %c0_9], %7 {strides = array<i32>} : memref<16x128xbf16, #tpu.memory_space<vmem>>, vector<16x128xbf16>,
    %cst_10 = arith.constant dense<0.000000e+00> : vector<128xf32>
    %9 = vector.multi_reduction <add>, %6, %cst_10 [0] : vector<16x128xf32> to vector<128xf32>
    %10 = vector.shape_cast %9 : vector<128xf32> to vector<1x128xf32>
    %c0_11 = arith.constant 0 : index
    %c0_12 = arith.constant 0 : index
    %c0_13 = arith.constant 0 : index
    %11 = vector.load %arg6[%c0_11, %c0_12, %c0_13] : memref<1x8x128xf32, #tpu.memory_space<vmem>>, vector<1x1x128xf32>
    %12 = vector.shape_cast %11 : vector<1x1x128xf32> to vector<1x128xf32>
    %13 = vector.shape_cast %10 : vector<1x128xf32> to vector<1x1x128xf32>
    tpu.vector_store %arg6[%c0_11, %c0_12, %c0_13], %13 {strides = array<i32>} : memref<1x8x128xf32, #tpu.memory_space<vmem>>, vector<1x1x128xf32>,
    %14 = arith.mulf %6, %6 : vector<16x128xf32>
    %cst_14 = arith.constant dense<0.000000e+00> : vector<128xf32>
    %15 = vector.multi_reduction <add>, %14, %cst_14 [0] : vector<16x128xf32> to vector<128xf32>
    %16 = vector.shape_cast %15 : vector<128xf32> to vector<1x128xf32>
    %c0_15 = arith.constant 0 : index
    %c1 = arith.constant 1 : index
    %c0_16 = arith.constant 0 : index
    %17 = vector.load %arg6[%c0_15, %c1, %c0_16] : memref<1x8x128xf32, #tpu.memory_space<vmem>>, vector<1x1x128xf32>
    %18 = vector.shape_cast %17 : vector<1x1x128xf32> to vector<1x128xf32>
    %19 = vector.shape_cast %16 : vector<1x128xf32> to vector<1x1x128xf32>
    tpu.vector_store %arg6[%c0_15, %c1, %c0_16], %19 {strides = array<i32>} : memref<1x8x128xf32, #tpu.memory_space<vmem>>, vector<1x1x128xf32>,
    return
  }
  func.func @transform_0(%arg0: i32) -> (i32, i32) {
    %c0_i32 = arith.constant 0 : i32
    %c0_i32_0 = arith.constant 0 : i32
    return %arg0, %c0_i32 : i32, i32
  }
  func.func @transform_1(%arg0: i32) -> (i32, i32) {
    %c0_i32 = arith.constant 0 : i32
    %c0_i32_0 = arith.constant 0 : i32
    return %arg0, %c0_i32 : i32, i32
  }
  func.func @transform_2(%arg0: i32) -> (i32, i32) {
    %c0_i32 = arith.constant 0 : i32
    %c0_i32_0 = arith.constant 0 : i32
    %c0_i32_1 = arith.constant 0 : i32
    return %c0_i32, %c0_i32_0 : i32, i32
  }
  func.func @transform_3(%arg0: i32) -> (i32, i32) {
    %c0_i32 = arith.constant 0 : i32
    %c0_i32_0 = arith.constant 0 : i32
    %c0_i32_1 = arith.constant 0 : i32
    return %c0_i32, %c0_i32_0 : i32, i32
  }
  func.func @transform_4(%arg0: i32) -> (i32, i32) {
    %c0_i32 = arith.constant 0 : i32
    %c0_i32_0 = arith.constant 0 : i32
    return %arg0, %c0_i32 : i32, i32
  }
  func.func @transform_5(%arg0: i32) -> (i32, i32, i32) {
    %c0_i32 = arith.constant 0 : i32
    %c0_i32_0 = arith.constant 0 : i32
    %c0_i32_1 = arith.constant 0 : i32
    return %arg0, %c0_i32, %c0_i32_0 : i32, i32, i32
  }
}

</mosaic_0001>

<bundles_post_ra>
// kernel: tree_forward.11
= control target key start
LH: loop header
LB: loop body
LE: loop exit
PB: predicated region body
PF: predicated region fallthrough
CT: control target
= control target key end

     0   :  { %s776_s12 = smov 0   ;;  %s872_s0 = inlined_call_operand.vmem [shape: bf16[2,18,128], index: 0, kind: input, shape index: {}]   ;;  %s873_s1 = inlined_call_operand.vmem [shape: bf16[3,128,128], index: 1, kind: input, shape index: {}]   ;;  %s874_s2 = inlined_call_operand.vmem [shape: bf16[2,16,128], index: 2, kind: output, shape index: {0}]   ;;  %s875_s3 = inlined_call_operand.vmem [shape: f32[2,8,128], index: 3, kind: output, shape index: {1}]  }
   0x1 LB: > { %s563_s13 = sadd.s32 4294967295, %s754_s12   ;;  %p567_p0 = scmp.ge.s32.totalorder %s754_s12, 1  ;;  %s754_s12 = sphi %s776_s12, %s14_s12  }
   0x2   : > { %p140_p1 = scmp.lt.s32.totalorder %s754_s12, 3 }
   0x4   : > { %p141_p2 = pnand %p567_p0, %p140_p1 }
   0x5   : > { %p168_p3 = scmp.lt.s32.totalorder (!%p141_p2), %s563_s13, 1 }
   0x6   : > { %144 = sbr.rel (%p141_p2) target bundleno = 204 (0xcc), region = 28 }
   0xb   : > { %v718_v0 = vld [vmem:[%s873_s1 + $0x78] sm:$0xff]  ;;  %v717_v3 = vld [vmem:[%s873_s1 + $0x70] sm:$0xff]  ;;  %s877_s13 = smov (!%p168_p3, %s563_s13), 1  ;;  %v716_v6 = vld [vmem:[%s873_s1 + $0x68] sm:$0xff]  ;;  %vm226_vm0 = vsmask.f32 7424 }
   0xc   : > { %v710_v1 = vld [vmem:[%s873_s1 + $0x38] sm:$0xff]  ;;  %288 = vmatpush.bf16.msra.mxu0 %v718_v0  ;;  %v709_v4 = vld [vmem:[%s873_s1 + $0x30] sm:$0xff]  ;;  %s739_s26 = smul.u32 12, %s877_s13  ;;  %v708_v7 = vld [vmem:[%s873_s1 + $0x28] sm:$0xff]  ;;  %vm386_vm1 = vcmask 1046528   ;;  %s702_s16 = sshll.u32 %s877_s13, 3 }
   0xd   : > { %v726_v2 = vld [vmem:[%s873_s1 + $0xb8] sm:$0xff]  ;;  %351 = vmatpush.bf16.msra.mxu1 %v710_v1  ;;  %v725_v5 = vld [vmem:[%s873_s1 + $0xb0] sm:$0xff]  ;;  %v724_v8 = vld [vmem:[%s873_s1 + $0xa8] sm:$0xff]  ;;  %s177_s19 = scalar_lea.vmem %s874_s2, %s702_s16  ;;  %s181_s21 = scalar_lea.vmem %s875_s3, %s702_s16 }
   0xe   : > { %439 = vmatpush.bf16.msra.mxu2 %v726_v2  ;;  %s172_s8 = scalar_lea.vmem %s872_s0, %s739_s26  ;;  %v715_v9 = vld [vmem:[%s873_s1 + $0x60] sm:$0xff]  ;;  %v714_v13 = vld [vmem:[%s873_s1 + $0x58] sm:$0xff]  ;;  %v713_v18 = vld [vmem:[%s873_s1 + $0x50] sm:$0xff] }
   0xf   : > { %v707_v10 = vld [vmem:[%s873_s1 + $0x20] sm:$0xff]  ;;  %v200_v12 = vld [vmem:[%s172_s8 + $0x8] sm:$0x1]  ;;  %v706_v14 = vld [vmem:[%s873_s1 + $0x18] sm:$0xff] }
  0x10   : > { %289 = vmatpush.bf16.msra.mxu0 %v717_v3  ;;  %v723_v11 = vld [vmem:[%s873_s1 + $0xa0] sm:$0xff]  ;;  %v223_v15 = vunpack.c.l.b16 %v200_v12  ;;  %v722_v16 = vld [vmem:[%s873_s1 + $0x98] sm:$0xff]  ;;  %v705_v19 = vld [vmem:[%s873_s1 + $0x10] sm:$0xff] }
  0x11   : > { %352 = vmatpush.bf16.msra.mxu1 %v709_v4  ;;  %v728_v17 = vld [vmem:[%s172_s8] sm:$0xff]   ;;  %v721_v22 = vld [vmem:[%s873_s1 + $0x90] sm:$0xff]  ;;  %v712_v25 = vld [vmem:[%s873_s1 + $0x48] sm:$0xff] }
  0x12   : > { %440 = vmatpush.bf16.msra.mxu2 %v725_v5  ;;  %v225_v20 = vpack.c.b16 %v223_v15, %v223_v15  ;;  %v230_v21 = vshll.u32 %v728_v17, 16  ;;  %v736_v23 = vld [vmem:[%s172_s8] sm:$0xf0]  ;;  %v737_v24 = vld [vmem:[%s172_s8] sm:$0xe]  ;;  %v704_v26 = vld [vmem:[%s873_s1 + $0x8] sm:$0xff] }
  0x13   : > { %v228_v27 = vshrl.u32 %v728_v17, 16  ;;  %v720_v30 = vld [vmem:[%s873_s1 + $0x88] sm:$0xff]  ;;  %v738_v31 = vor.u32 %v737_v24, %v736_v23  ;;  %v711_v32 = vld [vmem:[%s873_s1 + $0x40] sm:$0xff] }
  0x14   : > { %290 = vmatpush.bf16.msra.mxu0 %v716_v6  ;;  %v232_v28 = vrot.slane %v230_v21, 1  ;;  %v235_v29 = vshll.u32 %v225_v20, 16  ;;  %v703_v33 = vld [vmem:[%s873_s1] sm:$0xff]  ;;  %v388_v38 = vrot.slane %v225_v20, 1 }
  0x15   : > { %353 = vmatpush.bf16.msra.mxu1 %v708_v7  ;;  %v719_v36 = vld [vmem:[%s873_s1 + $0x80] sm:$0xff]  ;;  %v387_v37 = vrot.slane %v738_v31, 1 }
  0x16   : > { %441 = vmatpush.bf16.msra.mxu2 %v724_v8  ;;  %v233_v34 = vor.u32 %v232_v28, %v228_v27  ;;  %v237_v35 = vrot.slane %v235_v29, 1 }
  0x17   : > { %v389_v40 = vsel %vm386_vm1, %v387_v37, %v388_v38 }
  0x18   : > { %291 = vmatpush.bf16.msra.mxu0 %v715_v9  ;;  %v238_v39 = vsel %vm226_vm0, %v233_v34, %v237_v35 }
  0x19   : > { %354 = vmatpush.bf16.msra.mxu1 %v707_v10 }
  0x1a   : > { %442 = vmatpush.bf16.msra.mxu2 %v723_v11 }
  0x1c   : > { %292 = vmatpush.bf16.msra.mxu0 %v714_v13 }
  0x1d   : > { %355 = vmatpush.bf16.msra.mxu1 %v706_v14 }
  0x1e   : > { %443 = vmatpush.bf16.msra.mxu2 %v722_v16 }
  0x20   : > { %293 = vmatpush.bf16.msra.mxu0 %v713_v18 }
  0x21   : > { %356 = vmatpush.bf16.msra.mxu1 %v705_v19 }
  0x22   : > { %444 = vmatpush.bf16.msra.mxu2 %v721_v22 }
  0x24   : > { %294 = vmatpush.bf16.msra.mxu0 %v712_v25 }
  0x25   : > { %357 = vmatpush.bf16.msra.mxu1 %v704_v26 }
  0x26   : > { %445 = vmatpush.bf16.msra.mxu2 %v720_v30 }
  0x28   : > { %295 = vmatpush.bf16.msra.mxu0 %v711_v32 }
  0x29   : > { %358 = vmatpush.bf16.msra.mxu1 %v703_v33 }
  0x2a   : > { %446 = vmatpush.bf16.msra.mxu2 %v719_v36 }
  0x2b   : > { %296 = vmatmul.bf16.vlgmr.msra.gmra.mxu0 %v238_v39 }
  0x2c   : > { %359 = vmatmul.bf16.vlgmr.msra.gmra.mxu1 %v728_v17 }
  0x2d   : > { %447 = vmatmul.bf16.vlgmr.msra.gmra.mxu2 %v389_v40 }
  0xa8   : > { %v297_v41 = vpop.f32.mrf.mxu0 }
  0xa9   : > { %v360_v42 = vpop.f32.mrf.mxu1 }
  0xaa   : > { %v361_v44 = vadd.f32 %v360_v42, %v297_v41 }
  0xb0   : > { %v448_v43 = vpop.f32.mrf.mxu2  ;;  %v299_v45 = vpop.f32.mrf.mxu0 }
  0xb1   : > { %v362_v46 = vpop.f32.mrf.mxu1  ;;  %v453_v47 = vadd.f32 %v448_v43, %v361_v44 }
  0xb2   : > { %v363_v48 = vadd.f32 %v362_v46, %v299_v45 }
  0xb3   : > { %v467_v51 = vmul.f32 %v453_v47, %v453_v47 }
  0xb8   : > { %v450_v49 = vpop.f32.mrf.mxu2 }
  0xb9   : > { %v454_v50 = vadd.f32 %v450_v49, %v363_v48 }
  0xbb   : > { %v734_v52 = vpack.c.bf16 %v454_v50, %v453_v47  ;;  %v459_v53 = vadd.f32 %v454_v50, %v453_v47  ;;  %v468_v54 = vmul.f32 %v454_v50, %v454_v50 }
  0xbd   : > { %735 = vst [vmem:[%s177_s19] sm:$0xff] %v734_v52   ;;  %v460_v55 = vrot.slane %v459_v53, 4  ;;  %v469_v56 = vadd.f32 %v468_v54, %v467_v51 }
  0xbf   : > { %v461_v57 = vadd.f32 %v460_v55, %v459_v53  ;;  %v470_v58 = vrot.slane %v469_v56, 4 }
  0xc1   : > { %v462_v59 = vrot.slane %v461_v57, 2  ;;  %v471_v60 = vadd.f32 %v470_v58, %v469_v56 }
  0xc3   : > { %v463_v61 = vadd.f32 %v462_v59, %v461_v57  ;;  %v472_v62 = vrot.slane %v471_v60, 2 }
  0xc5   : > { %v464_v63 = vrot.slane %v463_v61, 1  ;;  %v473_v0 = vadd.f32 %v472_v62, %v471_v60 }
  0xc7   : > { %v465_v1 = vadd.f32 %v464_v63, %v463_v61  ;;  %v474_v2 = vrot.slane %v473_v0, 1 }
  0xc9   : > { %466 = vst [vmem:[%s181_s21] sm:$0x1] %v465_v1  ;;  %v475_v3 = vadd.f32 %v474_v2, %v473_v0 }
  0xcb   : > { %476 = vst [vmem:[%s181_s21 + $0x1] sm:$0x1] %v475_v3 }
  0xcc PF: > { %s14_s12 = sadd.s32 1, %s754_s12  }
  0xcd   : > { %p11_p4 = scmp.ge.s32.totalorder %s14_s12, 4  }
  0xcf   :  { %13 = sbr.rel (!%p11_p4) target bundleno = 1 (0x1), region = 72 }

// kernel: tile.63
= control target key start
LH: loop header
LB: loop body
LE: loop exit
PB: predicated region body
PF: predicated region fallthrough
CT: control target
= control target key end

     0   :  { %s28_s0 = inlined_call_operand.vmem [shape: f32[8], index: 0, kind: input, shape index: {}]   ;;  %s29_s1 = inlined_call_operand.vmem [shape: f32[16,8], index: 1, kind: output, shape index: {}]  }
   0x1   :  { %v4_v0 = vld [vmem:[%s28_s0] ss:$0 sm:$0xff] }
   0x2   :  { %5 = vst [vmem:[%s29_s1] sm:$0xff] %v4_v0 }
   0x3   :  { %8 = vst [vmem:[%s29_s1 + $0x8] sm:$0xff] %v4_v0 }

// kernel: tile.68
= control target key start
LH: loop header
LB: loop body
LE: loop exit
PB: predicated region body
PF: predicated region fallthrough
CT: control target
= control target key end

     0   :  { %s131_s10 = smov 120   ;;  %s132_s11 = smov 104   ;;  %vm3_vm0 = vcmask 64512   ;;  %vm9_vm1 = vcmask 1048512   ;;  %vm15_vm2 = vcmask 982912   ;;  %vm21_vm3 = vcmask 917312   ;;  %s207_s0 = inlined_call_operand.vmem [shape: f32[16,8], index: 0, kind: input, shape index: {}]   ;;  %s208_s1 = inlined_call_operand.vmem [shape: f32[1,128], index: 1, kind: output, shape index: {}]  }
   0x1   :  { %v101_v0 = vld [vmem:[%s207_s0 + $0xf] sm:$0x1]   ;;  %v103_v1 = vld [vmem:[%s207_s0 + $0xd] sm:$0x1]   ;;  %v105_v2 = vld [vmem:[%s207_s0 + $0xb] sm:$0x1]  }
   0x2   :  { %7 = vrot.lane.b32.xlu0 %v101_v0, %s131_s10  ;;  %19 = vrot.lane.b32.xlu1 %v103_v1, %s132_s11  ;;  %s133_s14 = smov 88   ;;  %v102_v3 = vld [vmem:[%s207_s0 + $0xe] sm:$0x1]   ;;  %v104_v4 = vld [vmem:[%s207_s0 + $0xc] sm:$0x1]   ;;  %s134_s19 = smov 112  }
   0x3   :  { %31 = vrot.lane.b32.xlu2 %v105_v2, %s133_s14  ;;  %s135_s20 = smov 96   ;;  %v106_v5 = vld [vmem:[%s207_s0 + $0xa] sm:$0x1]   ;;  %s136_s23 = smov 80   ;;  %v107_v6 = vld [vmem:[%s207_s0 + $0x9] sm:$0x1]  }
   0x4   :  { %v108_v7 = vld [vmem:[%s207_s0 + $0x8] sm:$0x1]   ;;  %s137_s28 = smov 72   ;;  %s138_s29 = smov 64   ;;  %v109_v8 = vld [vmem:[%s207_s0 + $0x7] sm:$0x1]  }
   0x5   :  { %s139_s3 = smov 56   ;;  %v110_v9 = vld [vmem:[%s207_s0 + $0x6] sm:$0x1]   ;;  %v111_v10 = vld [vmem:[%s207_s0 + $0x5] sm:$0x1]   ;;  %s140_s8 = smov 48  }
   0x6   :  { %s141_s9 = smov 40   ;;  %v112_v11 = vld [vmem:[%s207_s0 + $0x4] sm:$0x1]   ;;  %s142_s12 = smov 32   ;;  %v113_v12 = vld [vmem:[%s207_s0 + $0x3] sm:$0x1]  }
   0x7   :  { %v114_v13 = vld [vmem:[%s207_s0 + $0x2] sm:$0x1]   ;;  %s143_s17 = smov 24   ;;  %s144_s18 = smov 16   ;;  %v115_v14 = vld [vmem:[%s207_s0 + $0x1] sm:$0x1]  }
   0x8   :  { %s145_s21 = smov 8   ;;  %v2_v15 = vld [vmem:[%s207_s0] sm:$0x1]   ;;  %vm27_vm4 = vcmask 851712   ;;  %vm33_vm5 = vcmask 786112   ;;  %vm39_vm6 = vcmask 720512  }
   0x9   :  { %4 = vst.msk [vmem:[#allocation0] sm:$0x1] %vm3_vm0, %v2_v15   ;;  %vm45_vm7 = vcmask 654912   ;;  %vm51_vm8 = vcmask 589312   ;;  %vm57_vm9 = vcmask 523712   ;;  %vm63_vm10 = vcmask 458112  }
   0xa   :  { %13 = vrot.lane.b32.xlu0 %v102_v3, %s134_s19  ;;  %25 = vrot.lane.b32.xlu1 %v104_v4, %s135_s20  ;;  %vm69_vm11 = vcmask 392512   ;;  %vm75_vm12 = vcmask 326912   ;;  %vm81_vm13 = vcmask 261312   ;;  %vm87_vm14 = vcmask 195712  }
   0xb   :  { %37 = vrot.lane.b32.xlu2 %v106_v5, %s136_s23  ;;  %vm93_vm15 = vcmask 130112  }
  0x12   :  { %43 = vrot.lane.b32.xlu0 %v107_v6, %s137_s28  ;;  %49 = vrot.lane.b32.xlu1 %v108_v7, %s138_s29 }
  0x13   :  { %55 = vrot.lane.b32.xlu2 %v109_v8, %s139_s3 }
  0x1a   :  { %61 = vrot.lane.b32.xlu0 %v110_v9, %s140_s8  ;;  %67 = vrot.lane.b32.xlu1 %v111_v10, %s141_s9 }
  0x1b   :  { %73 = vrot.lane.b32.xlu2 %v112_v11, %s142_s12 }
  0x22   :  { %79 = vrot.lane.b32.xlu0 %v113_v12, %s143_s17  ;;  %85 = vrot.lane.b32.xlu1 %v114_v13, %s144_s18 }
  0x23   :  { %91 = vrot.lane.b32.xlu2 %v115_v14, %s145_s21 }
  0x5d   :  { %v32_v16 = vpop.permute.xlu2 %31  }
  0x65   :  { %v38_v17 = vpop.permute.xlu2 %37  }
  0x6d   :  { %v56_v18 = vpop.permute.xlu2 %55  }
  0x74   :  { %v8_v19 = vpop.permute.xlu0 %7   ;;  %v20_v20 = vpop.permute.xlu1 %19  }
  0x75   :  { %10 = vst.msk [vmem:[#allocation0] sm:$0x1] %vm9_vm1, %v8_v19   ;;  %v74_v21 = vpop.permute.xlu2 %73  }
  0x7c   :  { %v14_v22 = vpop.permute.xlu0 %13   ;;  %v26_v23 = vpop.permute.xlu1 %25  }
  0x7d   :  { %16 = vst.msk [vmem:[#allocation0] sm:$0x1] %vm15_vm2, %v14_v22   ;;  %v92_v24 = vpop.permute.xlu2 %91  }
  0x7e   :  { %22 = vst.msk [vmem:[#allocation0] sm:$0x1] %vm21_vm3, %v20_v20  }
  0x7f   :  { %28 = vst.msk [vmem:[#allocation0] sm:$0x1] %vm27_vm4, %v26_v23  }
  0x80   :  { %34 = vst.msk [vmem:[#allocation0] sm:$0x1] %vm33_vm5, %v32_v16  }
  0x81   :  { %40 = vst.msk [vmem:[#allocation0] sm:$0x1] %vm39_vm6, %v38_v17  }
  0x84   :  { %v44_v25 = vpop.permute.xlu0 %43   ;;  %v50_v26 = vpop.permute.xlu1 %49  }
  0x85   :  { %46 = vst.msk [vmem:[#allocation0] sm:$0x1] %vm45_vm7, %v44_v25  }
  0x86   :  { %52 = vst.msk [vmem:[#allocation0] sm:$0x1] %vm51_vm8, %v50_v26  }
  0x87   :  { %58 = vst.msk [vmem:[#allocation0] sm:$0x1] %vm57_vm9, %v56_v18  }
  0x8c   :  { %v62_v27 = vpop.permute.xlu0 %61   ;;  %v68_v28 = vpop.permute.xlu1 %67  }
  0x8d   :  { %64 = vst.msk [vmem:[#allocation0] sm:$0x1] %vm63_vm10, %v62_v27  }
  0x8e   :  { %70 = vst.msk [vmem:[#allocation0] sm:$0x1] %vm69_vm11, %v68_v28  }
  0x8f   :  { %76 = vst.msk [vmem:[#allocation0] sm:$0x1] %vm75_vm12, %v74_v21  }
  0x94   :  { %v80_v29 = vpop.permute.xlu0 %79   ;;  %v86_v30 = vpop.permute.xlu1 %85  }
  0x95   :  { %82 = vst.msk [vmem:[#allocation0] sm:$0x1] %vm81_vm13, %v80_v29  }
  0x96   :  { %88 = vst.msk [vmem:[#allocation0] sm:$0x1] %vm87_vm14, %v86_v30  }
  0x97   :  { %94 = vst.msk [vmem:[#allocation0] sm:$0x1] %vm93_vm15, %v92_v24  }
  0x9e   :  { %v97_v31 = vld [vmem:[#allocation0] sm:$0x1] }
  0x9f   :  { %100 = vst [vmem:[%s208_s1] sm:$0x1] %v97_v31 }

// kernel: tree_forward.12
= control target key start
LH: loop header
LB: loop body
LE: loop exit
PB: predicated region body
PF: predicated region fallthrough
CT: control target
= control target key end

     0   :  { %s310_s12 = smov 0   ;;  %s327_s0 = inlined_call_operand.vmem [shape: bf16[32,128], index: 0, kind: input, shape index: {}]   ;;  %s328_s1 = inlined_call_operand.vmem [shape: f32[1,128], index: 1, kind: input, shape index: {}]   ;;  %s329_s2 = inlined_call_operand.vmem [shape: f32[1,128], index: 2, kind: input, shape index: {}]   ;;  %s330_s3 = inlined_call_operand.vmem [shape: bf16[32,128], index: 3, kind: output, shape index: {}]  }
   0x1 LB: > { %s252_s13 = sadd.s32 4294967295, %s288_s12   ;;  %p256_p0 = scmp.ge.s32.totalorder %s288_s12, 1  ;;  %s288_s12 = sphi %s310_s12, %s13_s12  }
   0x2   : > { %p138_p1 = scmp.lt.s32.totalorder %s288_s12, 3 }
   0x4   : > { %p139_p2 = pnand %p256_p0, %p138_p1 }
   0x5   : > { %s257_s14 = sshll.u32 (!%p139_p2), %s252_s13, 1 }
   0x6   : > { %142 = sbr.rel (%p139_p2) target bundleno = 26 (0x1a), region = 32  ;;  %p163_p3 = scmp.lt.s32.totalorder (!%p139_p2), %s257_s14, 3 }
   0xb   : > { %s332_s14 = smov (!%p163_p3, %s257_s14), 3  ;;  %v280_v0 = vld [vmem:[%s328_s1] ss:$0 sm:$0xff] }
   0xc   : > { %s258_s15 = sshll.u32 %s332_s14, 2  ;;  %v281_v4 = vld [vmem:[%s329_s2] ss:$0 sm:$0xff] }
   0xd   : > { %s166_s18 = scalar_lea.vmem %s327_s0, %s258_s15  ;;  %s172_s25 = scalar_lea.vmem %s330_s3, %s258_s15 }
   0xe   : > { %v264_v1 = vld [vmem:[%s166_s18] sm:$0xff]  }
   0xf   : > { %v265_v2 = vunpack.c.l.bf16 %v264_v1  ;;  %v266_v3 = vunpack.c.h.bf16 %v264_v1 }
  0x11   : > { %v182_v5 = vmul.f32 %v280_v0, %v265_v2  ;;  %v183_v6 = vmul.f32 %v280_v0, %v266_v3 }
  0x13   : > { %v188_v7 = vadd.f32 %v281_v4, %v182_v5  ;;  %v189_v8 = vadd.f32 %v281_v4, %v183_v6 }
  0x15   : > { %v190_v9 = vmax.f32 %v188_v7, 0.0  ;;  %v191_v10 = vmax.f32 %v189_v8, 0.0 }
  0x17   : > { %v270_v11 = vpack.c.bf16 %v191_v10, %v190_v9 }
  0x19   : > { %271 = vst [vmem:[%s172_s25] sm:$0xff] %v270_v11  }
  0x1a PF: > { %s13_s12 = sadd.s32 1, %s288_s12  }
  0x1b   : > { %p10_p4 = scmp.ge.s32.totalorder %s13_s12, 4  }
  0x1d   :  { %12 = sbr.rel (!%p10_p4) target bundleno = 1 (0x1), region = 62 }

// kernel: tree_forward.13
= control target key start
LH: loop header
LB: loop body
LE: loop exit
PB: predicated region body
PF: predicated region fallthrough
CT: control target
= control target key end

     0   :  { %s1180_s12 = smov 0   ;;  %s1374_s0 = inlined_call_operand.vmem [shape: bf16[2,18,256], index: 0, kind: input, shape index: {}]   ;;  %s1375_s1 = inlined_call_operand.vmem [shape: bf16[3,256,128], index: 1, kind: input, shape index: {}]   ;;  %s1376_s2 = inlined_call_operand.vmem [shape: bf16[2,16,128], index: 2, kind: output, shape index: {0}]   ;;  %s1377_s3 = inlined_call_operand.vmem [shape: f32[2,8,128], index: 3, kind: output, shape index: {1}]  }
   0x1 LB: > { %s822_s13 = sadd.s32 4294967295, %s1158_s12   ;;  %p826_p0 = scmp.ge.s32.totalorder %s1158_s12, 1  ;;  %s1158_s12 = sphi %s1180_s12, %s14_s12  }
   0x2   : > { %p140_p1 = scmp.lt.s32.totalorder %s1158_s12, 3 }
   0x4   : > { %p141_p2 = pnand %p826_p0, %p140_p1 }
   0x5   : > { %p168_p3 = scmp.lt.s32.totalorder (!%p141_p2), %s822_s13, 1 }
   0x6   : > { %144 = sbr.rel (%p141_p2) target bundleno = 231 (0xe7), region = 28 }
   0xb   : > { %v1113_v0 = vld [vmem:[%s1375_s1 + $0xb8] sm:$0xff]  ;;  %v1112_v4 = vld [vmem:[%s1375_s1 + $0xb0] sm:$0xff]  ;;  %s1379_s13 = smov (!%p168_p3, %s822_s13), 1  ;;  %v1111_v8 = vld [vmem:[%s1375_s1 + $0xa8] sm:$0xff]  ;;  %vm263_vm0 = vsmask.f32 7424 }
   0xc   : > { %v1121_v1 = vld [vmem:[%s1375_s1 + $0xf8] sm:$0xff]  ;;  %386 = vmatpush.bf16.msra.mxu0 %v1113_v0  ;;  %v1120_v5 = vld [vmem:[%s1375_s1 + $0xf0] sm:$0xff]  ;;  %s1143_s30 = smul.u32 24, %s1379_s13  ;;  %v1119_v9 = vld [vmem:[%s1375_s1 + $0xe8] sm:$0xff]  ;;  %vm579_vm1 = vcmask 1046528   ;;  %s1089_s15 = sshll.u32 %s1379_s13, 3 }
   0xd   : > { %v1097_v2 = vld [vmem:[%s1375_s1 + $0x38] sm:$0xff]  ;;  %400 = vmatpush.bf16.msra.mxu1 %v1121_v1  ;;  %v1096_v6 = vld [vmem:[%s1375_s1 + $0x30] sm:$0xff]  ;;  %v1095_v10 = vld [vmem:[%s1375_s1 + $0x28] sm:$0xff]  ;;  %s177_s19 = scalar_lea.vmem %s1376_s2, %s1089_s15  ;;  %s181_s21 = scalar_lea.vmem %s1377_s3, %s1089_s15 }
   0xe   : > { %v1105_v3 = vld [vmem:[%s1375_s1 + $0x78] sm:$0xff]  ;;  %512 = vmatpush.bf16.msra.mxu2 %v1097_v2  ;;  %v1104_v7 = vld [vmem:[%s1375_s1 + $0x70] sm:$0xff]  ;;  %v1103_v11 = vld [vmem:[%s1375_s1 + $0x68] sm:$0xff]  ;;  %s1230_s16 = scalar_lea.vmem %s1374_s0, %s1143_s30 }
   0xf   : > { %526 = vmatpush.bf16.msra.mxu3 %v1105_v3  ;;  %v1110_v12 = vld [vmem:[%s1375_s1 + $0xa0] sm:$0xff]  ;;  %v1246_v17 = vld [vmem:[%s1230_s16 + $0x8] sm:$0xff]  ;;  %v216_v22 = vld [vmem:[%s1230_s16 + $0x10] sm:$0x11] }
  0x10   : > { %387 = vmatpush.bf16.msra.mxu0 %v1112_v4  ;;  %v1118_v13 = vld [vmem:[%s1375_s1 + $0xe0] sm:$0xff]  ;;  %v255_v19 = vunpack.c.l.b16 %v1246_v17  ;;  %v256_v21 = vunpack.c.h.b16 %v1246_v17  ;;  %v1109_v23 = vld [vmem:[%s1375_s1 + $0x98] sm:$0xff]  ;;  %v257_v27 = vunpack.c.l.b16 %v216_v22  ;;  %v258_v28 = vunpack.c.h.b16 %v216_v22  ;;  %v1108_v31 = vld [vmem:[%s1375_s1 + $0x90] sm:$0xff] }
  0x11   : > { %401 = vmatpush.bf16.msra.mxu1 %v1120_v5  ;;  %v1094_v14 = vld [vmem:[%s1375_s1 + $0x20] sm:$0xff]  ;;  %v1117_v24 = vld [vmem:[%s1375_s1 + $0xd8] sm:$0xff]  ;;  %v1116_v32 = vld [vmem:[%s1375_s1 + $0xd0] sm:$0xff] }
  0x12   : > { %513 = vmatpush.bf16.msra.mxu2 %v1096_v6  ;;  %v1102_v15 = vld [vmem:[%s1375_s1 + $0x60] sm:$0xff]  ;;  %v1093_v29 = vld [vmem:[%s1375_s1 + $0x18] sm:$0xff]  ;;  %v1273_v33 = vpack.c.b16 %v257_v27, %v257_v27  ;;  %v1275_v35 = vpack.c.b16 %v258_v28, %v258_v28  ;;  %v1092_v37 = vld [vmem:[%s1375_s1 + $0x10] sm:$0xff] }
  0x13   : > { %527 = vmatpush.bf16.msra.mxu3 %v1104_v7  ;;  %v182_v16 = vld [vmem:[%s1230_s16] sm:$0xff]  ;;  %v1101_v30 = vld [vmem:[%s1375_s1 + $0x58] sm:$0xff]  ;;  %v1100_v38 = vld [vmem:[%s1375_s1 + $0x50] sm:$0xff] }
  0x14   : > { %388 = vmatpush.bf16.msra.mxu0 %v1111_v8  ;;  %v253_v18 = vunpack.c.l.b16 %v182_v16  ;;  %v254_v20 = vunpack.c.h.b16 %v182_v16  ;;  %v1107_v41 = vld [vmem:[%s1375_s1 + $0x88] sm:$0xff]  ;;  %v272_v44 = vshll.u32 %v1273_v33, 16  ;;  %v284_v46 = vshll.u32 %v1275_v35, 16  ;;  %v1106_v49 = vld [vmem:[%s1375_s1 + $0x80] sm:$0xff]  ;;  %v1129_v56 = vld [vmem:[%s1375_s1 + $0x138] sm:$0xff] }
  0x15   : > { %402 = vmatpush.bf16.msra.mxu1 %v1119_v9  ;;  %v1115_v42 = vld [vmem:[%s1375_s1 + $0xc8] sm:$0xff]  ;;  %v1114_v50 = vld [vmem:[%s1375_s1 + $0xc0] sm:$0xff]  ;;  %v1137_v57 = vld [vmem:[%s1375_s1 + $0x178] sm:$0xff]  ;;  %v581_v16 = vrot.slane %v1273_v33, 1 }
  0x16   : > { %514 = vmatpush.bf16.msra.mxu2 %v1095_v10  ;;  %v259_v25 = vpack.c.b16 %v255_v19, %v253_v18  ;;  %v260_v26 = vpack.c.b16 %v256_v21, %v254_v20  ;;  %v1091_v47 = vld [vmem:[%s1375_s1 + $0x8] sm:$0xff]  ;;  %v274_v52 = vrot.slane %v272_v44, 1  ;;  %v286_v54 = vrot.slane %v284_v46, 1  ;;  %v1090_v55 = vld [vmem:[%s1375_s1] sm:$0xff]  ;;  %v1128_v61 = vld [vmem:[%s1375_s1 + $0x130] sm:$0xff] }
  0x17   : > { %528 = vmatpush.bf16.msra.mxu3 %v1103_v11  ;;  %v1099_v48 = vld [vmem:[%s1375_s1 + $0x48] sm:$0xff]  ;;  %v1098_v58 = vld [vmem:[%s1375_s1 + $0x40] sm:$0xff]  ;;  %v1136_v62 = vld [vmem:[%s1375_s1 + $0x170] sm:$0xff]  ;;  %v584_v20 = vrot.slane %v1275_v35, 1 }
  0x18   : > { %389 = vmatpush.bf16.msra.mxu0 %v1110_v12  ;;  %v267_v34 = vshll.u32 %v259_v25, 16  ;;  %v279_v36 = vshll.u32 %v260_v26, 16  ;;  %v265_v39 = vshrl.u32 %v259_v25, 16  ;;  %v277_v40 = vshrl.u32 %v260_v26, 16  ;;  %v1127_v63 = vld [vmem:[%s1375_s1 + $0x128] sm:$0xff]  ;;  %v1126_v1 = vld [vmem:[%s1375_s1 + $0x120] sm:$0xff] }
  0x19   : > { %403 = vmatpush.bf16.msra.mxu1 %v1118_v13  ;;  %v1135_v0 = vld [vmem:[%s1375_s1 + $0x168] sm:$0xff]  ;;  %v1134_v2 = vld [vmem:[%s1375_s1 + $0x160] sm:$0xff]  ;;  %v1125_v3 = vld [vmem:[%s1375_s1 + $0x118] sm:$0xff] }
  0x1a   : > { %515 = vmatpush.bf16.msra.mxu2 %v1094_v14  ;;  %v269_v43 = vrot.slane %v267_v34, 1  ;;  %v281_v45 = vrot.slane %v279_v36, 1  ;;  %v1133_v4 = vld [vmem:[%s1375_s1 + $0x158] sm:$0xff]  ;;  %v540_v5 = vld [vmem:[%s1230_s16] sm:$0xee]  ;;  %v1124_v6 = vld [vmem:[%s1375_s1 + $0x110] sm:$0xff] }
  0x1b   : > { %529 = vmatpush.bf16.msra.mxu3 %v1102_v15  ;;  %v575_v7 = vunpack.c.l.b16 %v540_v5  ;;  %v1132_v8 = vld [vmem:[%s1375_s1 + $0x150] sm:$0xff]  ;;  %v576_v9 = vunpack.c.h.b16 %v540_v5  ;;  %v1123_v10 = vld [vmem:[%s1375_s1 + $0x108] sm:$0xff]  ;;  %v1122_v14 = vld [vmem:[%s1375_s1 + $0x100] sm:$0xff] }
  0x1c   : > { %390 = vmatpush.bf16.msra.mxu0 %v1109_v23  ;;  %v270_v51 = vor.u32 %v269_v43, %v265_v39  ;;  %v282_v53 = vor.u32 %v281_v45, %v277_v40  ;;  %v1131_v12 = vld [vmem:[%s1375_s1 + $0x148] sm:$0xff]  ;;  %v1130_v18 = vld [vmem:[%s1375_s1 + $0x140] sm:$0xff] }
  0x1d   : > { %404 = vmatpush.bf16.msra.mxu1 %v1117_v24  ;;  %v577_v11 = vpack.c.b16 %v255_v19, %v575_v7  ;;  %v578_v13 = vpack.c.b16 %v256_v21, %v576_v9 }
  0x1e   : > { %516 = vmatpush.bf16.msra.mxu2 %v1093_v29  ;;  %v275_v59 = vsel %vm263_vm0, %v270_v51, %v274_v52  ;;  %v287_v60 = vsel %vm263_vm0, %v282_v53, %v286_v54 }
  0x1f   : > { %530 = vmatpush.bf16.msra.mxu3 %v1101_v30  ;;  %v580_v15 = vrot.slane %v577_v11, 1  ;;  %v583_v19 = vrot.slane %v578_v13, 1 }
  0x20   : > { %391 = vmatpush.bf16.msra.mxu0 %v1108_v31 }
  0x21   : > { %405 = vmatpush.bf16.msra.mxu1 %v1116_v32  ;;  %v582_v17 = vsel %vm579_vm1, %v580_v15, %v581_v16  ;;  %v585_v21 = vsel %vm579_vm1, %v583_v19, %v584_v20 }
  0x22   : > { %517 = vmatpush.bf16.msra.mxu2 %v1092_v37 }
  0x23   : > { %531 = vmatpush.bf16.msra.mxu3 %v1100_v38 }
  0x24   : > { %392 = vmatpush.bf16.msra.mxu0 %v1107_v41 }
  0x25   : > { %406 = vmatpush.bf16.msra.mxu1 %v1115_v42 }
  0x26   : > { %518 = vmatpush.bf16.msra.mxu2 %v1091_v47 }
  0x27   : > { %532 = vmatpush.bf16.msra.mxu3 %v1099_v48 }
  0x28   : > { %393 = vmatpush.bf16.msra.mxu0 %v1106_v49 }
  0x29   : > { %407 = vmatpush.bf16.msra.mxu1 %v1114_v50 }
  0x2a   : > { %519 = vmatpush.bf16.msra.mxu2 %v1090_v55 }
  0x2b   : > { %533 = vmatpush.bf16.msra.mxu3 %v1098_v58  ;;  %394 = vmatmul.bf16.vlgmr.msra.gmra.mxu0 %v275_v59 }
  0x2c   : > { %684 = vmatpush.bf16.msrb.mxu0 %v1129_v56  ;;  %408 = vmatmul.bf16.vlgmr.msra.gmra.mxu1 %v287_v60 }
  0x2d   : > { %698 = vmatpush.bf16.msrb.mxu1 %v1137_v57  ;;  %520 = vmatmul.bf16.vlgmr.msra.gmra.mxu2 %v259_v25 }
  0x2e   : > { %534 = vmatmul.bf16.vlgmr.msra.gmra.mxu3 %v260_v26 }
  0x30   : > { %685 = vmatpush.bf16.msrb.mxu0 %v1128_v61 }
  0x31   : > { %699 = vmatpush.bf16.msrb.mxu1 %v1136_v62 }
  0x34   : > { %686 = vmatpush.bf16.msrb.mxu0 %v1127_v63 }
  0x35   : > { %700 = vmatpush.bf16.msrb.mxu1 %v1135_v0 }
  0x38   : > { %687 = vmatpush.bf16.msrb.mxu0 %v1126_v1 }
  0x39   : > { %701 = vmatpush.bf16.msrb.mxu1 %v1134_v2 }
  0x3c   : > { %688 = vmatpush.bf16.msrb.mxu0 %v1125_v3 }
  0x3d   : > { %702 = vmatpush.bf16.msrb.mxu1 %v1133_v4 }
  0x40   : > { %689 = vmatpush.bf16.msrb.mxu0 %v1124_v6 }
  0x41   : > { %703 = vmatpush.bf16.msrb.mxu1 %v1132_v8 }
  0x44   : > { %690 = vmatpush.bf16.msrb.mxu0 %v1123_v10 }
  0x45   : > { %704 = vmatpush.bf16.msrb.mxu1 %v1131_v12 }
  0x48   : > { %691 = vmatpush.bf16.msrb.mxu0 %v1122_v14 }
  0x49   : > { %705 = vmatpush.bf16.msrb.mxu1 %v1130_v18 }
  0x4b   : > { %692 = vmatmul.bf16.vlgmr.msrb.gmra.mxu0 %v582_v17 }
  0x4c   : > { %706 = vmatmul.bf16.vlgmr.msrb.gmra.mxu1 %v585_v21 }
  0xa8   : > { %v395_v22 = vpop.f32.mrf.mxu0 }
  0xa9   : > { %v409_v23 = vpop.f32.mrf.mxu1 }
  0xaa   : > { %v410_v28 = vadd.f32 %v409_v23, %v395_v22 }
  0xb0   : > { %v397_v24 = vpop.f32.mrf.mxu0  ;;  %v521_v25 = vpop.f32.mrf.mxu2 }
  0xb1   : > { %v411_v26 = vpop.f32.mrf.mxu1  ;;  %v535_v27 = vpop.f32.mrf.mxu3  ;;  %v522_v33 = vadd.f32 %v521_v25, %v410_v28 }
  0xb2   : > { %v412_v31 = vadd.f32 %v411_v26, %v397_v24 }
  0xb3   : > { %v536_v37 = vadd.f32 %v535_v27, %v522_v33 }
  0xb8   : > { %v523_v32 = vpop.f32.mrf.mxu2 }
  0xb9   : > { %v524_v34 = vadd.f32 %v523_v32, %v412_v31  ;;  %v537_v36 = vpop.f32.mrf.mxu3 }
  0xbb   : > { %v538_v40 = vadd.f32 %v537_v36, %v524_v34 }
  0xc8   : > { %v693_v29 = vpop.f32.mrf.mxu0 }
  0xc9   : > { %v707_v30 = vpop.f32.mrf.mxu1 }
  0xca   : > { %v708_v35 = vadd.f32 %v707_v30, %v693_v29 }
  0xcc   : > { %v712_v41 = vadd.f32 %v708_v35, %v536_v37 }
  0xce   : > { %v726_v44 = vmul.f32 %v712_v41, %v712_v41 }
  0xd0   : > { %v695_v38 = vpop.f32.mrf.mxu0 }
  0xd1   : > { %v709_v39 = vpop.f32.mrf.mxu1 }
  0xd2   : > { %v710_v42 = vadd.f32 %v709_v39, %v695_v38 }
  0xd4   : > { %v713_v43 = vadd.f32 %v710_v42, %v538_v40 }
  0xd6   : > { %v1141_v45 = vpack.c.bf16 %v713_v43, %v712_v41  ;;  %v718_v46 = vadd.f32 %v713_v43, %v712_v41  ;;  %v727_v47 = vmul.f32 %v713_v43, %v713_v43 }
  0xd8   : > { %1142 = vst [vmem:[%s177_s19] sm:$0xff] %v1141_v45   ;;  %v719_v48 = vrot.slane %v718_v46, 4  ;;  %v728_v49 = vadd.f32 %v727_v47, %v726_v44 }
  0xda   : > { %v720_v50 = vadd.f32 %v719_v48, %v718_v46  ;;  %v729_v51 = vrot.slane %v728_v49, 4 }
  0xdc   : > { %v721_v52 = vrot.slane %v720_v50, 2  ;;  %v730_v53 = vadd.f32 %v729_v51, %v728_v49 }
  0xde   : > { %v722_v54 = vadd.f32 %v721_v52, %v720_v50  ;;  %v731_v55 = vrot.slane %v730_v53, 2 }
  0xe0   : > { %v723_v56 = vrot.slane %v722_v54, 1  ;;  %v732_v57 = vadd.f32 %v731_v55, %v730_v53 }
  0xe2   : > { %v724_v58 = vadd.f32 %v723_v56, %v722_v54  ;;  %v733_v59 = vrot.slane %v732_v57, 1 }
  0xe4   : > { %725 = vst [vmem:[%s181_s21] sm:$0x1] %v724_v58  ;;  %v734_v60 = vadd.f32 %v733_v59, %v732_v57 }
  0xe6   : > { %735 = vst [vmem:[%s181_s21 + $0x1] sm:$0x1] %v734_v60 }
  0xe7 PF: > { %s14_s12 = sadd.s32 1, %s1158_s12  }
  0xe8   : > { %p11_p4 = scmp.ge.s32.totalorder %s14_s12, 4  }
  0xea   :  { %13 = sbr.rel (!%p11_p4) target bundleno = 1 (0x1), region = 72 }

// kernel: tree_forward.14
= control target key start
LH: loop header
LB: loop body
LE: loop exit
PB: predicated region body
PF: predicated region fallthrough
CT: control target
= control target key end

     0   :  { %s431_s12 = smov 0   ;;  %s468_s0 = inlined_call_operand.vmem [shape: bf16[32,64], index: 0, kind: input, shape index: {}]   ;;  %s469_s1 = inlined_call_operand.vmem [shape: bf16[64,128], index: 1, kind: input, shape index: {}]   ;;  %s470_s2 = inlined_call_operand.vmem [shape: bf16[32,128], index: 2, kind: output, shape index: {0}]   ;;  %s471_s3 = inlined_call_operand.vmem [shape: f32[2,8,128], index: 3, kind: output, shape index: {1}]  }
   0x1 LB: > { %s437_s13 = sadd.s32 4294967295, %s409_s12   ;;  %p356_p0 = scmp.ge.s32.totalorder %s409_s12, 1  ;;  %s409_s12 = sphi %s431_s12, %s14_s12  }
   0x2   : > { %p141_p1 = scmp.lt.s32.totalorder %s409_s12, 3 }
   0x4   : > { %p142_p2 = pnand %p356_p0, %p141_p1 }
   0x5   : > { %s357_s16 = sshll.u32 (!%p142_p2), %s437_s13, 1  ;;  %p181_p4 = scmp.lt.s32.totalorder (!%p142_p2), %s437_s13, 1 }
   0x6   : > { %145 = sbr.rel (%p142_p2) target bundleno = 178 (0xb2), region = 28  ;;  %p170_p3 = scmp.lt.s32.totalorder (!%p142_p2), %s357_s16, 3 }
   0xb   : > { %v389_v0 = vld [vmem:[%s469_s1 + $0x18] sm:$0xff]  ;;  %v388_v1 = vld [vmem:[%s469_s1 + $0x10] sm:$0xff]  ;;  %s473_s16 = smov (!%p170_p3, %s357_s16), 3  ;;  %v387_v2 = vld [vmem:[%s469_s1 + $0x8] sm:$0xff]  ;;  %vm225_vm0 = vcmask 523264   ;;  %s475_s13 = smov (!%p181_p4, %s437_s13), 1 }
   0xc   : > { %233 = vmatpush.bf16.msra.mxu0 %v389_v0  ;;  %s358_s21 = sshll.u32 %s473_s16, 2  ;;  %v386_v3 = vld [vmem:[%s469_s1] sm:$0xff]  ;;  %s361_s30 = sshll.u32 %s475_s13, 3 }
   0xd   : > { %s173_s26 = scalar_lea.vmem %s468_s0, %s358_s21  ;;  %s179_s29 = scalar_lea.vmem %s470_s2, %s358_s21 }
   0xe   : > { %v385_v4 = vld [vmem:[%s173_s26] sm:$0xff]  ;;  %s184_s6 = scalar_lea.vmem %s471_s3, %s361_s30 }
  0x10   : > { %234 = vmatpush.bf16.msra.mxu0 %v388_v1 }
  0x14   : > { %235 = vmatpush.bf16.msra.mxu0 %v387_v2 }
  0x18   : > { %236 = vmatpush.bf16.msra.mxu0 %v386_v3 }
  0x1b   : > { %382 = vmatmul.msk.bf16.vlgmr.msra.gmra.mxu0 %vm225_vm0, %v385_v4 }
  0x98   : > { %v238_v5 = vpop.f32.mrf.mxu0 }
  0x99   : > { %v255_v7 = vmul.f32 %v238_v5, %v238_v5 }
  0xa0   : > { %v240_v6 = vpop.f32.mrf.mxu0 }
  0xa1   : > { %v393_v8 = vpack.c.bf16 %v240_v6, %v238_v5  ;;  %v247_v9 = vadd.f32 %v240_v6, %v238_v5  ;;  %v256_v10 = vmul.f32 %v240_v6, %v240_v6 }
  0xa3   : > { %394 = vst [vmem:[%s179_s29] sm:$0xff] %v393_v8   ;;  %v248_v11 = vrot.slane %v247_v9, 4  ;;  %v257_v12 = vadd.f32 %v256_v10, %v255_v7 }
  0xa5   : > { %v249_v13 = vadd.f32 %v248_v11, %v247_v9  ;;  %v258_v14 = vrot.slane %v257_v12, 4 }
  0xa7   : > { %v250_v15 = vrot.slane %v249_v13, 2  ;;  %v259_v16 = vadd.f32 %v258_v14, %v257_v12 }
  0xa9   : > { %v251_v17 = vadd.f32 %v250_v15, %v249_v13  ;;  %v260_v18 = vrot.slane %v259_v16, 2 }
  0xab   : > { %v252_v19 = vrot.slane %v251_v17, 1  ;;  %v261_v20 = vadd.f32 %v260_v18, %v259_v16 }
  0xad   : > { %v253_v21 = vadd.f32 %v252_v19, %v251_v17  ;;  %v262_v22 = vrot.slane %v261_v20, 1 }
  0xaf   : > { %254 = vst [vmem:[%s184_s6] sm:$0x1] %v253_v21  ;;  %v263_v23 = vadd.f32 %v262_v22, %v261_v20 }
  0xb1   : > { %264 = vst [vmem:[%s184_s6 + $0x1] sm:$0x1] %v263_v23 }
  0xb2 PF: > { %s14_s12 = sadd.s32 1, %s409_s12  }
  0xb3   : > { %p11_p5 = scmp.ge.s32.totalorder %s14_s12, 4  }
  0xb5   :  { %13 = sbr.rel (!%p11_p5) target bundleno = 1 (0x1), region = 70 }

// kernel: tree_forward.15
= control target key start
LH: loop header
LB: loop body
LE: loop exit
PB: predicated region body
PF: predicated region fallthrough
CT: control target
= control target key end

     0   :  { %s466_s21 = smov 0   ;;  %s498_s0 = inlined_call_operand.vmem [shape: bf16[32,128], index: 0, kind: input, shape index: {}]   ;;  %s499_s1 = inlined_call_operand.vmem [shape: f32[1,128], index: 1, kind: input, shape index: {}]   ;;  %s500_s2 = inlined_call_operand.vmem [shape: f32[1,128], index: 2, kind: input, shape index: {}]   ;;  %s501_s3 = inlined_call_operand.vmem [shape: bf16[32,128], index: 3, kind: input, shape index: {}]   ;;  %s502_s4 = inlined_call_operand.vmem [shape: f32[1,128], index: 4, kind: input, shape index: {}]   ;;  %s503_s5 = inlined_call_operand.vmem [shape: f32[1,128], index: 5, kind: input, shape index: {}]   ;;  %s504_s6 = inlined_call_operand.vmem [shape: bf16[32,128], index: 6, kind: output, shape index: {}]  }
   0x1 LB: > { %s385_s22 = sadd.s32 4294967295, %s429_s21   ;;  %p389_p0 = scmp.ge.s32.totalorder %s429_s21, 1  ;;  %s429_s21 = sphi %s466_s21, %s16_s21  }
   0x2   : > { %p224_p1 = scmp.lt.s32.totalorder %s429_s21, 3 }
   0x4   : > { %p225_p2 = pnand %p389_p0, %p224_p1 }
   0x5   : > { %s390_s23 = sshll.u32 (!%p225_p2), %s385_s22, 1 }
   0x6   : > { %228 = sbr.rel (%p225_p2) target bundleno = 30 (0x1e), region = 44  ;;  %p260_p3 = scmp.lt.s32.totalorder (!%p225_p2), %s390_s23, 3 }
   0xb   : > { %s506_s23 = smov (!%p260_p3, %s390_s23), 3  ;;  %v419_v0 = vld [vmem:[%s499_s1] ss:$0 sm:$0xff] }
   0xc   : > { %s391_s24 = sshll.u32 %s506_s23, 2  ;;  %v421_v1 = vld [vmem:[%s502_s4] ss:$0 sm:$0xff] }
   0xd   : > { %s263_s27 = scalar_lea.vmem %s498_s0, %s391_s24  ;;  %s269_s30 = scalar_lea.vmem %s501_s3, %s391_s24  ;;  %v420_v6 = vld [vmem:[%s500_s2] ss:$0 sm:$0xff] }
   0xe   : > { %v399_v2 = vld [vmem:[%s263_s27] sm:$0xff]   ;;  %s275_s17 = scalar_lea.vmem %s504_s6, %s391_s24 }
   0xf   : > { %v403_v3 = vld [vmem:[%s269_s30] sm:$0xff]   ;;  %v400_v4 = vunpack.c.l.bf16 %v399_v2  ;;  %v401_v5 = vunpack.c.h.bf16 %v399_v2 }
  0x10   : > { %v404_v7 = vunpack.c.l.bf16 %v403_v3  ;;  %v405_v8 = vunpack.c.h.bf16 %v403_v3  ;;  %v422_v15 = vld [vmem:[%s503_s5] ss:$0 sm:$0xff] }
  0x11   : > { %v285_v9 = vmul.f32 %v419_v0, %v400_v4  ;;  %v286_v10 = vmul.f32 %v419_v0, %v401_v5 }
  0x12   : > { %v301_v11 = vmul.f32 %v421_v1, %v404_v7  ;;  %v302_v12 = vmul.f32 %v421_v1, %v405_v8 }
  0x13   : > { %v291_v13 = vadd.f32 %v420_v6, %v285_v9  ;;  %v292_v14 = vadd.f32 %v420_v6, %v286_v10 }
  0x15   : > { %v303_v16 = vadd.f32 %v301_v11, %v291_v13  ;;  %v304_v17 = vadd.f32 %v302_v12, %v292_v14 }
  0x17   : > { %v309_v18 = vadd.f32 %v422_v15, %v303_v16  ;;  %v310_v19 = vadd.f32 %v422_v15, %v304_v17 }
  0x19   : > { %v311_v20 = vmax.f32 %v309_v18, 0.0  ;;  %v312_v21 = vmax.f32 %v310_v19, 0.0 }
  0x1b   : > { %v409_v22 = vpack.c.bf16 %v312_v21, %v311_v20 }
  0x1d   : > { %410 = vst [vmem:[%s275_s17] sm:$0xff] %v409_v22  }
  0x1e PF: > { %s16_s21 = sadd.s32 1, %s429_s21  }
  0x1f   : > { %p13_p4 = scmp.ge.s32.totalorder %s16_s21, 4  }
  0x21   :  { %15 = sbr.rel (!%p13_p4) target bundleno = 1 (0x1), region = 77 }

// kernel: tree_forward.19
= control target key start
LH: loop header
LB: loop body
LE: loop exit
PB: predicated region body
PF: predicated region fallthrough
CT: control target
= control target key end

     0   :  { %s388_s15 = smov 0   ;;  %s414_s0 = inlined_call_operand.vmem [shape: bf16[32,128], index: 0, kind: input, shape index: {}]   ;;  %s415_s1 = inlined_call_operand.vmem [shape: f32[1,128], index: 1, kind: input, shape index: {}]   ;;  %s416_s2 = inlined_call_operand.vmem [shape: f32[1,128], index: 2, kind: input, shape index: {}]   ;;  %s417_s3 = inlined_call_operand.vmem [shape: bf16[32,128], index: 3, kind: input, shape index: {}]   ;;  %s418_s4 = inlined_call_operand.vmem [shape: bf16[32,128], index: 4, kind: output, shape index: {}]  }
   0x1 LB: > { %s319_s16 = sadd.s32 4294967295, %s361_s15   ;;  %p323_p0 = scmp.ge.s32.totalorder %s361_s15, 1  ;;  %s361_s15 = sphi %s388_s15, %s14_s15  }
   0x2   : > { %p174_p1 = scmp.lt.s32.totalorder %s361_s15, 3 }
   0x4   : > { %p175_p2 = pnand %p323_p0, %p174_p1 }
   0x5   : > { %s324_s17 = sshll.u32 (!%p175_p2), %s319_s16, 1 }
   0x6   : > { %178 = sbr.rel (%p175_p2) target bundleno = 28 (0x1c), region = 36  ;;  %p206_p3 = scmp.lt.s32.totalorder (!%p175_p2), %s324_s17, 3 }
   0xb   : > { %s420_s17 = smov (!%p206_p3, %s324_s17), 3  ;;  %v353_v0 = vld [vmem:[%s415_s1] ss:$0 sm:$0xff] }
   0xc   : > { %s325_s18 = sshll.u32 %s420_s17, 2  ;;  %v354_v5 = vld [vmem:[%s416_s2] ss:$0 sm:$0xff] }
   0xd   : > { %s209_s21 = scalar_lea.vmem %s414_s0, %s325_s18  ;;  %s215_s24 = scalar_lea.vmem %s417_s3, %s325_s18 }
   0xe   : > { %v333_v1 = vld [vmem:[%s209_s21] sm:$0xff]   ;;  %s221_s5 = scalar_lea.vmem %s418_s4, %s325_s18 }
   0xf   : > { %v337_v2 = vld [vmem:[%s215_s24] sm:$0xff]   ;;  %v334_v3 = vunpack.c.l.bf16 %v333_v1  ;;  %v335_v4 = vunpack.c.h.bf16 %v333_v1 }
  0x10   : > { %v338_v8 = vunpack.c.l.bf16 %v337_v2  ;;  %v339_v9 = vunpack.c.h.bf16 %v337_v2 }
  0x11   : > { %v231_v6 = vmul.f32 %v353_v0, %v334_v3  ;;  %v232_v7 = vmul.f32 %v353_v0, %v335_v4 }
  0x13   : > { %v237_v10 = vadd.f32 %v354_v5, %v231_v6  ;;  %v238_v11 = vadd.f32 %v354_v5, %v232_v7 }
  0x15   : > { %v243_v12 = vadd.f32 %v338_v8, %v237_v10  ;;  %v244_v13 = vadd.f32 %v339_v9, %v238_v11 }
  0x17   : > { %v245_v14 = vmax.f32 %v243_v12, 0.0  ;;  %v246_v15 = vmax.f32 %v244_v13, 0.0 }
  0x19   : > { %v343_v16 = vpack.c.bf16 %v246_v15, %v245_v14 }
  0x1b   : > { %344 = vst [vmem:[%s221_s5] sm:$0xff] %v343_v16  }
  0x1c PF: > { %s14_s15 = sadd.s32 1, %s361_s15  }
  0x1d   : > { %p11_p4 = scmp.ge.s32.totalorder %s14_s15, 4  }
  0x1f   :  { %13 = sbr.rel (!%p11_p4) target bundleno = 1 (0x1), region = 69 }

// kernel: tree_forward.20
= control target key start
LH: loop header
LB: loop body
LE: loop exit
PB: predicated region body
PF: predicated region fallthrough
CT: control target
= control target key end

     0   :  { %s709_s18 = smov 0   ;;  %s785_s0 = inlined_call_operand.vmem [shape: bf16[32,128], index: 0, kind: input, shape index: {}]   ;;  %s786_s1 = inlined_call_operand.vmem [shape: bf16[32,128], index: 1, kind: input, shape index: {}]   ;;  %s787_s2 = inlined_call_operand.vmem [shape: bf16[128,128], index: 2, kind: input, shape index: {}]   ;;  %s788_s3 = inlined_call_operand.vmem [shape: bf16[128,128], index: 3, kind: input, shape index: {}]   ;;  %s789_s4 = inlined_call_operand.vmem [shape: bf16[32,128], index: 4, kind: output, shape index: {0}]   ;;  %s790_s5 = inlined_call_operand.vmem [shape: f32[2,8,128], index: 5, kind: output, shape index: {1}]  }
   0x1 LB: > { %s715_s19 = sadd.s32 4294967295, %s677_s18   ;;  %p558_p0 = scmp.ge.s32.totalorder %s677_s18, 1  ;;  %s677_s18 = sphi %s709_s18, %s16_s18  }
   0x2   : > { %p202_p1 = scmp.lt.s32.totalorder %s677_s18, 3 }
   0x4   : > { %p203_p2 = pnand %p558_p0, %p202_p1 }
   0x5   : > { %s559_s11 = sshll.u32 (!%p203_p2), %s715_s19, 1  ;;  %p257_p4 = scmp.lt.s32.totalorder (!%p203_p2), %s715_s19, 1 }
   0x6   : > { %206 = sbr.rel (%p203_p2) target bundleno = 197 (0xc5), region = 36  ;;  %p240_p3 = scmp.lt.s32.totalorder (!%p203_p2), %s559_s11, 3 }
   0xb   : > { %v657_v0 = vld [vmem:[%s788_s3 + $0x38] sm:$0xff]  ;;  %v656_v2 = vld [vmem:[%s788_s3 + $0x30] sm:$0xff]  ;;  %v655_v4 = vld [vmem:[%s788_s3 + $0x28] sm:$0xff]  ;;  %s792_s11 = smov (!%p240_p3, %s559_s11), 3  ;;  %s794_s19 = smov (!%p257_p4, %s715_s19), 1 }
   0xc   : > { %v648_v1 = vld [vmem:[%s787_s2 + $0x38] sm:$0xff]  ;;  %351 = vmatpush.bf16.msra.mxu0 %v657_v0  ;;  %v647_v3 = vld [vmem:[%s787_s2 + $0x30] sm:$0xff]  ;;  %v646_v5 = vld [vmem:[%s787_s2 + $0x28] sm:$0xff]  ;;  %s560_s26 = sshll.u32 %s792_s11, 2  ;;  %s565_s15 = sshll.u32 %s794_s19, 3 }
   0xd   : > { %419 = vmatpush.bf16.msra.mxu1 %v648_v1  ;;  %v654_v6 = vld [vmem:[%s788_s3 + $0x20] sm:$0xff]  ;;  %v653_v8 = vld [vmem:[%s788_s3 + $0x18] sm:$0xff]  ;;  %v652_v10 = vld [vmem:[%s788_s3 + $0x10] sm:$0xff]  ;;  %s249_s8 = scalar_lea.vmem %s786_s1, %s560_s26  ;;  %s243_s12 = scalar_lea.vmem %s785_s0, %s560_s26 }
   0xe   : > { %v645_v7 = vld [vmem:[%s787_s2 + $0x20] sm:$0xff]  ;;  %v644_v9 = vld [vmem:[%s787_s2 + $0x18] sm:$0xff]  ;;  %v643_v11 = vld [vmem:[%s787_s2 + $0x10] sm:$0xff]  ;;  %s255_s14 = scalar_lea.vmem %s789_s4, %s560_s26  ;;  %s260_s20 = scalar_lea.vmem %s790_s5, %s565_s15 }
   0xf   : > { %v651_v12 = vld [vmem:[%s788_s3 + $0x8] sm:$0xff]  ;;  %v650_v14 = vld [vmem:[%s788_s3] sm:$0xff] }
  0x10   : > { %352 = vmatpush.bf16.msra.mxu0 %v656_v2  ;;  %v642_v13 = vld [vmem:[%s787_s2 + $0x8] sm:$0xff]  ;;  %v641_v15 = vld [vmem:[%s787_s2] sm:$0xff] }
  0x11   : > { %420 = vmatpush.bf16.msra.mxu1 %v647_v3  ;;  %v649_v16 = vld [vmem:[%s249_s8] sm:$0xff] }
  0x12   : > { %v640_v17 = vld [vmem:[%s243_s12] sm:$0xff] }
  0x14   : > { %353 = vmatpush.bf16.msra.mxu0 %v655_v4 }
  0x15   : > { %421 = vmatpush.bf16.msra.mxu1 %v646_v5 }
  0x18   : > { %354 = vmatpush.bf16.msra.mxu0 %v654_v6 }
  0x19   : > { %422 = vmatpush.bf16.msra.mxu1 %v645_v7 }
  0x1c   : > { %355 = vmatpush.bf16.msra.mxu0 %v653_v8 }
  0x1d   : > { %423 = vmatpush.bf16.msra.mxu1 %v644_v9 }
  0x20   : > { %356 = vmatpush.bf16.msra.mxu0 %v652_v10 }
  0x21   : > { %424 = vmatpush.bf16.msra.mxu1 %v643_v11 }
  0x24   : > { %357 = vmatpush.bf16.msra.mxu0 %v651_v12 }
  0x25   : > { %425 = vmatpush.bf16.msra.mxu1 %v642_v13 }
  0x28   : > { %358 = vmatpush.bf16.msra.mxu0 %v650_v14 }
  0x29   : > { %426 = vmatpush.bf16.msra.mxu1 %v641_v15 }
  0x2b   : > { %359 = vmatmul.bf16.vlgmr.msra.gmra.mxu0 %v649_v16 }
  0x2c   : > { %427 = vmatmul.bf16.vlgmr.msra.gmra.mxu1 %v640_v17 }
  0xa8   : > { %v360_v18 = vpop.f32.mrf.mxu0 }
  0xa9   : > { %v428_v19 = vpop.f32.mrf.mxu1 }
  0xaa   : > { %v429_v20 = vadd.f32 %v428_v19, %v360_v18 }
  0xac   : > { %v445_v24 = vmul.f32 %v429_v20, %v429_v20 }
  0xb0   : > { %v362_v21 = vpop.f32.mrf.mxu0 }
  0xb1   : > { %v430_v22 = vpop.f32.mrf.mxu1 }
  0xb2   : > { %v431_v23 = vadd.f32 %v430_v22, %v362_v21 }
  0xb4   : > { %v661_v25 = vpack.c.bf16 %v431_v23, %v429_v20  ;;  %v437_v26 = vadd.f32 %v431_v23, %v429_v20  ;;  %v446_v27 = vmul.f32 %v431_v23, %v431_v23 }
  0xb6   : > { %662 = vst [vmem:[%s255_s14] sm:$0xff] %v661_v25   ;;  %v438_v28 = vrot.slane %v437_v26, 4  ;;  %v447_v29 = vadd.f32 %v446_v27, %v445_v24 }
  0xb8   : > { %v439_v30 = vadd.f32 %v438_v28, %v437_v26  ;;  %v448_v31 = vrot.slane %v447_v29, 4 }
  0xba   : > { %v440_v32 = vrot.slane %v439_v30, 2  ;;  %v449_v33 = vadd.f32 %v448_v31, %v447_v29 }
  0xbc   : > { %v441_v34 = vadd.f32 %v440_v32, %v439_v30  ;;  %v450_v35 = vrot.slane %v449_v33, 2 }
  0xbe   : > { %v442_v36 = vrot.slane %v441_v34, 1  ;;  %v451_v37 = vadd.f32 %v450_v35, %v449_v33 }
  0xc0   : > { %v443_v38 = vadd.f32 %v442_v36, %v441_v34  ;;  %v452_v39 = vrot.slane %v451_v37, 1 }
  0xc2   : > { %444 = vst [vmem:[%s260_s20] sm:$0x1] %v443_v38  ;;  %v453_v40 = vadd.f32 %v452_v39, %v451_v37 }
  0xc4   : > { %454 = vst [vmem:[%s260_s20 + $0x1] sm:$0x1] %v453_v40 }
  0xc5 PF: > { %s16_s18 = sadd.s32 1, %s677_s18  }
  0xc6   : > { %p13_p5 = scmp.ge.s32.totalorder %s16_s18, 4  }
  0xc8   :  { %15 = sbr.rel (!%p13_p5) target bundleno = 1 (0x1), region = 81 }

</bundles_post_ra>
